<compile_context>
chip_gen: v7x
topology: tpu7x:2x2x1
jax: 0.10.0
libtpu: 0.0.40
codegen_flags: <defaults>
</compile_context>

<pallas_src>
import jax
import jax.numpy as jnp
from jax.experimental import pallas as pl
from jax.experimental.pallas import tpu as pltpu


def dwc_patch_embed_pallas(x, w_dw, w_pw, gamma, beta, run_mean, run_var,
                           *, stride=1, eps=1e-5):
    """x: (B, C, H, W) NCHW.  w_dw: (C, 1, k, k) depthwise conv weight,
    w_pw: (Cout, C, 1, 1) pointwise conv weight (PyTorch conv layouts).
    gamma/beta/run_mean/run_var: (Cout,) BatchNorm2d parameters (eval mode)."""
    B, C, H, W = map(int, x.shape)
    k = int(w_dw.shape[-1])
    Cout = int(w_pw.shape[0])
    if stride != 1:
        # TODO(synk): stride > 1 (strided depthwise windows) not implemented in-kernel.
        raise NotImplementedError("stride > 1 not supported by this Pallas kernel")

    p = (k - 1) // 2
    Wp = W + 2 * p
    Ho = H + 2 * p - k + 1
    Wo = W + 2 * p - k + 1

    dsize = jnp.dtype(x.dtype).itemsize
    # Stem-style small C: fold the depthwise conv into the MXU matmul (K = k*k*C).
    use_fold = (k * k * C) <= 256

    # ---- row-tile size TH (VMEM-budget driven); ragged tail handled by padding ----
    row_out_bytes = Wo * Cout * dsize
    if use_fold:
        row_work_bytes = Wo * k * k * C * (dsize + 2) + Wo * Cout * 8
    else:
        row_work_bytes = Wo * C * 8 + Wo * Cout * 8
    TH = min(Ho,
             max(8, (512 << 10) // max(row_out_bytes, 1)),
             max(8, (6 << 20) // max(row_work_bytes, 1)))
    TH = max(TH, 1)
    n_rt = int(pl.cdiv(Ho, TH))
    Ho_pad = n_rt * TH                     # kernel computes Ho_pad rows; wrapper slices
    Hp_ext = Ho_pad + k - 1                # padded input rows needed

    # ---------------- wrapper-side layout & parameter folding (trace time) ----------------
    x_nhwc = jnp.transpose(x, (0, 2, 3, 1))                                   # (B, H, W, C)
    pad_bottom = Hp_ext - (H + p)
    x_pad = jnp.pad(x_nhwc, ((0, 0), (p, pad_bottom), (p, p), (0, 0)))        # (B, Hp_ext, Wp, C)

    f32 = jnp.float32
    wdw_taps = jnp.transpose(w_dw.reshape(C, k * k), (1, 0)).astype(f32)      # (k*k, C)
    wpw_mat = jnp.transpose(w_pw.reshape(Cout, C), (1, 0)).astype(f32)        # (C, Cout)
    inv_std = 1.0 / jnp.sqrt(run_var.astype(f32) + eps)
    scale = gamma.astype(f32) * inv_std                                       # (Cout,)
    shift = (beta.astype(f32) - run_mean.astype(f32) * scale).reshape(1, Cout)
    wpw_scaled = wpw_mat * scale[None, :]                                     # BN scale folded

    if use_fold:
        # Fully folded weight: W_full[(kh*k+kw)*C + c, co] = w_dw[c,kh,kw]*w_pw[co,c]*scale[co]
        w_full = (wdw_taps[:, :, None] * wpw_scaled[None, :, :]
                  ).reshape(k * k * C, Cout).astype(jnp.bfloat16)

        def kernel(x_ref, w_ref, shift_ref, o_ref):
            # x_ref: (1, Hp_ext, Wp, C) padded sample (VMEM-resident across row tiles)
            # o_ref: (1, TH, Wo, Cout)
            rt = pl.program_id(1)
            row0 = rt * TH
            slab = x_ref[0, pl.ds(row0, TH + k - 1), :, :]           # (TH+k-1, Wp, C)
            # im2col: one (TH*Wo, k*k*C) patch matrix from k*k shifted slices.
            pieces = []
            for kh in range(k):
                for kw in range(k):
                    pieces.append(
                        slab[kh:kh + TH, kw:kw + Wo, :].reshape(TH * Wo, C))
            patches = jnp.concatenate(pieces, axis=-1).astype(jnp.bfloat16)
            # Single MXU matmul for the whole tile (M = TH*Wo, K = k*k*C).
            y = jnp.dot(patches, w_ref[...], preferred_element_type=jnp.float32)
            y = y + shift_ref[...]                                   # folded BN shift
            y = y * jnp.clip(y + 3.0, 0.0, 6.0) * (1.0 / 6.0)        # hardswish
            o_ref[...] = y.reshape(1, TH, Wo, Cout).astype(o_ref.dtype)

        operands = (x_pad, w_full, shift)
        in_specs = [
            pl.BlockSpec((1, Hp_ext, Wp, C), lambda b, i: (b, 0, 0, 0)),  # x per-sample
            pl.BlockSpec((k * k * C, Cout), lambda b, i: (0, 0)),          # folded weights
            pl.BlockSpec((1, Cout), lambda b, i: (0, 0)),                  # BN shift
        ]
        w_bytes = k * k * C * Cout * 2 + Cout * 4
    else:
        wpw_bf16 = wpw_scaled.astype(jnp.bfloat16)

        def kernel(x_ref, wdw_ref, wpw_ref, shift_ref, o_ref):
            rt = pl.program_id(1)
            row0 = rt * TH
            slab = x_ref[0, pl.ds(row0, TH + k - 1), :, :].astype(jnp.float32)
            dw = wdw_ref[...]                                        # (k*k, C), hoisted
            acc = None
            for kh in range(k):            # depthwise over the whole tile at once
                for kw in range(k):
                    tap = dw[kh * k + kw:kh * k + kw + 1, :]         # (1, C)
                    term = slab[kh:kh + TH, kw:kw + Wo, :] * tap     # (TH, Wo, C)
                    acc = term if acc is None else acc + term
            # One batched pointwise matmul for the whole tile.
            lhs = acc.reshape(TH * Wo, C).astype(jnp.bfloat16)
            y = jnp.dot(lhs, wpw_ref[...], preferred_element_type=jnp.float32)
            y = y + shift_ref[...]
            y = y * jnp.clip(y + 3.0, 0.0, 6.0) * (1.0 / 6.0)
            o_ref[...] = y.reshape(1, TH, Wo, Cout).astype(o_ref.dtype)

        operands = (x_pad, wdw_taps, wpw_bf16, shift)
        in_specs = [
            pl.BlockSpec((1, Hp_ext, Wp, C), lambda b, i: (b, 0, 0, 0)),  # x per-sample
            pl.BlockSpec((k * k, C), lambda b, i: (0, 0)),                 # dw taps
            pl.BlockSpec((C, Cout), lambda b, i: (0, 0)),                  # pw (BN-scaled)
            pl.BlockSpec((1, Cout), lambda b, i: (0, 0)),                  # BN shift
        ]
        w_bytes = k * k * C * 4 + C * Cout * 2 + Cout * 4

    # Explicit VMEM budget (defaults: 16 MiB v5e / 32 MiB v6e,v7x scoped).
    x_block_bytes = Hp_ext * Wp * C * dsize
    out_block_bytes = TH * Wo * Cout * dsize
    work_bytes = TH * row_work_bytes + (TH + k - 1) * Wp * C * 4
    est = 2 * x_block_bytes + 2 * out_block_bytes + w_bytes + work_bytes
    vmem_limit = int(min(max(2 * est, 32 << 20), 48 << 20))

    # TODO(synk): for very large H*W*C samples (v7x's 64 MiB VMEM), stream a
    # (TH+k-1)-row halo slab via memory_space=pl.ANY + manual double-buffered DMA
    # instead of keeping the whole padded sample VMEM-resident.
    out_nhwc = pl.pallas_call(
        kernel,
        out_shape=jax.ShapeDtypeStruct((B, Ho_pad, Wo, Cout), x.dtype),
        grid_spec=pltpu.PrefetchScalarGridSpec(
            num_scalar_prefetch=0,
            grid=(B, n_rt),
            in_specs=in_specs,
            out_specs=pl.BlockSpec((1, TH, Wo, Cout), lambda b, i: (b, i, 0, 0)),
        ),
        compiler_params=pltpu.CompilerParams(
            dimension_semantics=("parallel", "parallel"),
            vmem_limit_bytes=vmem_limit,
        ),
    )(*operands)

    out_nhwc = out_nhwc[:, :Ho]                                       # drop padded rows
    return jnp.transpose(out_nhwc, (0, 3, 1, 2))                      # back to NCHW


def dwc_patch_embed_reference(x, w_dw, w_pw, gamma, beta, run_mean, run_var,
                              *, stride=1, eps=1e-5):
    """Pure-JAX reference mirroring the PyTorch forward (eval-mode BN)."""
    B, C, H, W = x.shape
    k = w_dw.shape[-1]
    p = (k - 1) // 2
    y = jax.lax.conv_general_dilated(
        x, w_dw, window_strides=(stride, stride), padding=[(p, p), (p, p)],
        dimension_numbers=("NCHW", "OIHW", "NCHW"), feature_group_count=C,
        precision=jax.lax.Precision.HIGHEST)
    y = jax.lax.conv_general_dilated(
        y, w_pw, window_strides=(1, 1), padding="VALID",
        dimension_numbers=("NCHW", "OIHW", "NCHW"),
        precision=jax.lax.Precision.HIGHEST)
    g = gamma.reshape(1, -1, 1, 1)
    b = beta.reshape(1, -1, 1, 1)
    m = run_mean.reshape(1, -1, 1, 1)
    v = run_var.reshape(1, -1, 1, 1)
    y = (y - m) / jnp.sqrt(v + eps) * g + b
    return y * jnp.clip(y + 3.0, 0.0, 6.0) / 6.0


if __name__ == "__main__":
    def run_case(name, B, Cin, H, W, embed_dim, patch_size):
        key = jax.random.PRNGKey(0)
        kx, kdw, kpw, kg, kb, km, kv = jax.random.split(key, 7)
        x = jax.random.normal(kx, (B, Cin, H, W), dtype=jnp.float32)
        w_dw = 0.2 * jax.random.normal(kdw, (Cin, 1, patch_size, patch_size), jnp.float32)
        w_pw = 0.2 * jax.random.normal(kpw, (embed_dim, Cin, 1, 1), jnp.float32)
        gamma = 1.0 + 0.1 * jax.random.normal(kg, (embed_dim,), jnp.float32)
        beta = 0.1 * jax.random.normal(kb, (embed_dim,), jnp.float32)
        run_mean = 0.1 * jax.random.normal(km, (embed_dim,), jnp.float32)
        run_var = jax.random.uniform(kv, (embed_dim,), jnp.float32, 0.5, 1.5)

        out = dwc_patch_embed_pallas(x, w_dw, w_pw, gamma, beta, run_mean, run_var)
        out = jax.block_until_ready(out)
        ref = dwc_patch_embed_reference(x, w_dw, w_pw, gamma, beta, run_mean, run_var)
        assert out.shape == ref.shape == (B, embed_dim, H, W), name
        err = float(jnp.max(jnp.abs(out - ref)))
        # bf16 MXU matmul (DEFAULT-style precision) -> loosened vs. f32-exact reference.
        assert jnp.allclose(out, ref, atol=2e-2, rtol=2e-2), f"{name}: max|err|={err}"

    # Stem-style config: small C -> depthwise folded into the im2col MXU matmul.
    run_case("stem", B=2, Cin=3, H=16, W=16, embed_dim=32, patch_size=3)
    # Wider-C config exercising the two-stage (depthwise FMAs + pointwise matmul) path.
    run_case("wide", B=2, Cin=32, H=16, W=16, embed_dim=64, patch_size=3)

    print("KERNEL_OK")
</pallas_src>

<mosaic_0001>
module attributes {stable_mosaic.version = 11 : i64} {
  func.func @kernel(%arg0: i32, %arg1: i32, %arg2: memref<1x18x18x3xf32, #tpu.memory_space<vmem>>, %arg3: memref<27x32xbf16, #tpu.memory_space<vmem>>, %arg4: memref<1x32xf32, #tpu.memory_space<vmem>>, %arg5: memref<1x16x16x32xf32, #tpu.memory_space<vmem>>) attributes {dimension_semantics = [#tpu.dimension_semantics<parallel>, #tpu.dimension_semantics<parallel>], iteration_bounds = array<i64: 2, 1>, scalar_prefetch = 0 : i64, scratch_operands = 0 : i64, tpu.core_type = #tpu.core_type<tc>, window_params = [{transform_indices = @transform_0, window_bounds = array<i64: 1, 18, 18, 3>}, {pipeline_mode = #tpu.pipeline_mode<synchronous>, transform_indices = @transform_1, window_bounds = array<i64: 27, 32>}, {pipeline_mode = #tpu.pipeline_mode<synchronous>, transform_indices = @transform_2, window_bounds = array<i64: 1, 32>}, {transform_indices = @transform_3, window_bounds = array<i64: 1, 16, 16, 32>}]} {
    %c16_i32 = arith.constant 16 : i32
    %0 = arith.muli %arg1, %c16_i32 : i32
    %c0 = arith.constant 0 : index
    %1 = arith.index_cast %0 : i32 to index
    %c0_0 = arith.constant 0 : index
    %c0_1 = arith.constant 0 : index
    %2 = vector.load %arg2[%c0, %1, %c0_0, %c0_1] : memref<1x18x18x3xf32, #tpu.memory_space<vmem>>, vector<1x18x18x3xf32>
    %3 = vector.shape_cast %2 : vector<1x18x18x3xf32> to vector<18x18x3xf32>
    %4 = vector.extract_strided_slice %3 {offsets = [0, 0, 0], sizes = [16, 16, 3], strides = [1, 1, 1]} : vector<18x18x3xf32> to vector<16x16x3xf32>
    %5 = vector.shape_cast %4 : vector<16x16x3xf32> to vector<256x3xf32>
    %6 = vector.extract_strided_slice %3 {offsets = [0, 1, 0], sizes = [16, 16, 3], strides = [1, 1, 1]} : vector<18x18x3xf32> to vector<16x16x3xf32>
    %7 = vector.shape_cast %6 : vector<16x16x3xf32> to vector<256x3xf32>
    %8 = vector.extract_strided_slice %3 {offsets = [0, 2, 0], sizes = [16, 16, 3], strides = [1, 1, 1]} : vector<18x18x3xf32> to vector<16x16x3xf32>
    %9 = vector.shape_cast %8 : vector<16x16x3xf32> to vector<256x3xf32>
    %10 = vector.extract_strided_slice %3 {offsets = [1, 0, 0], sizes = [16, 16, 3], strides = [1, 1, 1]} : vector<18x18x3xf32> to vector<16x16x3xf32>
    %11 = vector.shape_cast %10 : vector<16x16x3xf32> to vector<256x3xf32>
    %12 = vector.extract_strided_slice %3 {offsets = [1, 1, 0], sizes = [16, 16, 3], strides = [1, 1, 1]} : vector<18x18x3xf32> to vector<16x16x3xf32>
    %13 = vector.shape_cast %12 : vector<16x16x3xf32> to vector<256x3xf32>
    %14 = vector.extract_strided_slice %3 {offsets = [1, 2, 0], sizes = [16, 16, 3], strides = [1, 1, 1]} : vector<18x18x3xf32> to vector<16x16x3xf32>
    %15 = vector.shape_cast %14 : vector<16x16x3xf32> to vector<256x3xf32>
    %16 = vector.extract_strided_slice %3 {offsets = [2, 0, 0], sizes = [16, 16, 3], strides = [1, 1, 1]} : vector<18x18x3xf32> to vector<16x16x3xf32>
    %17 = vector.shape_cast %16 : vector<16x16x3xf32> to vector<256x3xf32>
    %18 = vector.extract_strided_slice %3 {offsets = [2, 1, 0], sizes = [16, 16, 3], strides = [1, 1, 1]} : vector<18x18x3xf32> to vector<16x16x3xf32>
    %19 = vector.shape_cast %18 : vector<16x16x3xf32> to vector<256x3xf32>
    %20 = vector.extract_strided_slice %3 {offsets = [2, 2, 0], sizes = [16, 16, 3], strides = [1, 1, 1]} : vector<18x18x3xf32> to vector<16x16x3xf32>
    %21 = vector.shape_cast %20 : vector<16x16x3xf32> to vector<256x3xf32>
    %22 = tpu.concatenate %5, %7, %9, %11, %13, %15, %17, %19, %21 in 1 : vector<256x3xf32>, vector<256x3xf32>, vector<256x3xf32>, vector<256x3xf32>, vector<256x3xf32>, vector<256x3xf32>, vector<256x3xf32>, vector<256x3xf32>, vector<256x3xf32> -> vector<256x27xf32>
    %23 = arith.truncf %22 : vector<256x27xf32> to vector<256x27xbf16>
    %c0_2 = arith.constant 0 : index
    %c0_3 = arith.constant 0 : index
    %24 = vector.load %arg3[%c0_2, %c0_3] : memref<27x32xbf16, #tpu.memory_space<vmem>>, vector<27x32xbf16>
    %cst = arith.constant dense<0.000000e+00> : vector<256x32xf32>
    %25 = tpu.matmul %23, %24, %cst {dimension_numbers = #tpu.dot_dimension_numbers<[1], [0], [0], [1], [0, 0, 1, 1], [], []>} : vector<256x27xbf16>, vector<27x32xbf16>, vector<256x32xf32> -> vector<256x32xf32>
    %c0_4 = arith.constant 0 : index
    %c0_5 = arith.constant 0 : index
    %26 = vector.load %arg4[%c0_4, %c0_5] : memref<1x32xf32, #tpu.memory_space<vmem>>, vector<1x32xf32>
    %27 = vector.broadcast %26 : vector<1x32xf32> to vector<256x32xf32>
    %28 = arith.addf %25, %27 : vector<256x32xf32>
    %cst_6 = arith.constant 3.000000e+00 : f32
    %29 = vector.broadcast %cst_6 : f32 to vector<256x32xf32>
    %30 = arith.addf %28, %29 : vector<256x32xf32>
    %cst_7 = arith.constant 0.000000e+00 : f32
    %cst_8 = arith.constant 6.000000e+00 : f32
    %31 = vector.broadcast %cst_7 : f32 to vector<256x32xf32>
    %32 = arith.maximumf %31, %30 : vector<256x32xf32>
    %33 = vector.broadcast %cst_8 : f32 to vector<256x32xf32>
    %34 = arith.minimumf %33, %32 : vector<256x32xf32>
    %35 = arith.mulf %28, %34 : vector<256x32xf32>
    %cst_9 = arith.constant 0.166666672 : f32
    %36 = vector.broadcast %cst_9 : f32 to vector<256x32xf32>
    %37 = arith.mulf %35, %36 : vector<256x32xf32>
    %38 = vector.shape_cast %37 : vector<256x32xf32> to vector<1x16x16x32xf32>
    %c0_10 = arith.constant 0 : index
    %c0_11 = arith.constant 0 : index
    %c0_12 = arith.constant 0 : index
    %c0_13 = arith.constant 0 : index
    %39 = vector.load %arg5[%c0_10, %c0_11, %c0_12, %c0_13] : memref<1x16x16x32xf32, #tpu.memory_space<vmem>>, vector<1x16x16x32xf32>
    tpu.vector_store %arg5[%c0_10, %c0_11, %c0_12, %c0_13], %38 {strides = array<i32>} : memref<1x16x16x32xf32, #tpu.memory_space<vmem>>, vector<1x16x16x32xf32>,
    return
  }
  func.func @transform_0(%arg0: i32, %arg1: i32) -> (i32, i32, i32, i32) {
    %c0_i32 = arith.constant 0 : i32
    %c0_i32_0 = arith.constant 0 : i32
    %c0_i32_1 = arith.constant 0 : i32
    %c0_i32_2 = arith.constant 0 : i32
    return %arg0, %c0_i32, %c0_i32_0, %c0_i32_1 : i32, i32, i32, i32
  }
  func.func @transform_1(%arg0: i32, %arg1: i32) -> (i32, i32) {
    %c0_i32 = arith.constant 0 : i32
    %c0_i32_0 = arith.constant 0 : i32
    %c0_i32_1 = arith.constant 0 : i32
    return %c0_i32, %c0_i32_0 : i32, i32
  }
  func.func @transform_2(%arg0: i32, %arg1: i32) -> (i32, i32) {
    %c0_i32 = arith.constant 0 : i32
    %c0_i32_0 = arith.constant 0 : i32
    %c0_i32_1 = arith.constant 0 : i32
    return %c0_i32, %c0_i32_0 : i32, i32
  }
  func.func @transform_3(%arg0: i32, %arg1: i32) -> (i32, i32, i32, i32) {
    %c0_i32 = arith.constant 0 : i32
    %c0_i32_0 = arith.constant 0 : i32
    %c0_i32_1 = arith.constant 0 : i32
    return %arg0, %arg1, %c0_i32, %c0_i32_0 : i32, i32, i32, i32
  }
}

</mosaic_0001>

<bundles_post_ra>
// kernel: tpu_custom_call.1
= control target key start
LH: loop header
LB: loop body
LE: loop exit
PB: predicated region body
PF: predicated region fallthrough
CT: control target
= control target key end

     0   :  { %8 = vsyncpa [#allocation3], 0  ;;  %s4537_s0 = inlined_call_operand.vmem [shape: f32[2,18,18,3], index: 0, kind: input, shape index: {}]   ;;  %s4538_s1 = inlined_call_operand.vmem [shape: bf16[27,32], index: 1, kind: input, shape index: {}]   ;;  %s4539_s2 = inlined_call_operand.vmem [shape: f32[1,32], index: 2, kind: input, shape index: {}]   ;;  %s4540_s3 = inlined_call_operand.hbm [shape: f32[2,16,16,32], index: 3, kind: output, shape index: {}]  }
   0x1   :  { %10 = vsyncpa [#allocation3 + $0x1], 0  ;;  %s2978_s12 = smov 0   ;;  %s2980_s13 = smov 0  }
   0x2   :  { %s2982_s14 = smov 0   ;;  %s2984_s15 = smov 0  }
   0x3   :  { %s2986_s16 = smov 0   ;;  %s2988_s17 = smov 0  }
   0x4 LB: > { %s2049_s18 = sadd.s32 4294967295, %s2944_s17   ;;  %s2050_s19 = sadd.s32 4294967294, %s2944_s17   ;;  %s2944_s17 = sphi %s2988_s17, %s16_s17   ;;  %s2940_s16 = sphi %s2986_s16, %s4666_s16   ;;  %s2936_s15 = sphi %s2984_s15, %s4665_s15   ;;  %s2932_s14 = sphi %s2982_s14, %s4664_s14   ;;  %s2928_s13 = sphi %s2980_s13, %s4663_s13   ;;  %s2924_s12 = sphi %s2978_s12, %s4662_s12  }
   0x5   : > { %s28_s20 = sadd.s32 1, %s2940_s16  ;;  %s105_s21 = sadd.s32 1, %s2932_s14 }
   0x6   : > { %p30_p0 = scmp.ge.s32.totalorder %s28_s20, 2  ;;  %p115_p1 = scmp.ne.s32.totalorder %s2932_s14, %s2928_s13 }
   0x7   : > { %p116_p2 = scmp.eq.s32.totalorder %s2049_s18, 1  ;;  %p121_p3 = scmp.ne.s32.totalorder %s2928_s13, %s2924_s12 }
   0x8   : > { %s4668_s20 = smov (%p30_p0, %s28_s20), 0  ;;  %p122_p5 = scmp.eq.s32.totalorder %s2050_s19, 1 }
   0x9   : > { %p3018_p4 = por %p116_p2, %p115_p1  ;;  %s100_s23 = ssub.s32 %s2940_s16, %s4668_s20 }
   0xa   : > { %p2053_p6 = scmp.ge.s32.totalorder %s2944_s17, 1  ;;  %p103_p7 = scmp.eq.s32.totalorder %s100_s23, 0 }
   0xb   : > { %p3025_p8 = por %p122_p5, %p121_p3  ;;  %p154_p9 = scmp.lt.s32.totalorder %s2944_s17, 3 }
   0xc   : > { %s3031_s25 = scalar_select %p103_p7, %s2932_s14, %s105_s21  }
   0xd   : > { %p155_p10 = pnand %p2053_p6, %p154_p9 }
   0xf   : > { %158 = sbr.rel (%p155_p10) target bundleno = 651 (0x28b), region = 32 }
  0x16   : > { %p178_p11 = scmp.lt.s32.totalorder %s2936_s15, 1  ;;  %vm290_vm0 = vcmask 1046528   ;;  %s2946_s4 = smov 3   ;;  %vm371_vm1 = vcmask 1045504   ;;  %vm1597_vm2 = vcmask 1044480   ;;  %vm1246_vm3 = vcmask 23552  }
  0x17   : > { %s2947_s5 = smov 6   ;;  %s2948_s6 = smov 9   ;;  %vm1279_vm4 = vcmask 48128   ;;  %vm1312_vm5 = vcmask 72704   ;;  %vm1345_vm6 = vcmask 97280   ;;  %vm1378_vm7 = vcmask 121856  }
  0x18   : > { %s179_s26 = scalar_select %p178_p11, %s2936_s15, 1  ;;  %vm1411_vm8 = vcmask 146432   ;;  %vm1444_vm9 = vcmask 171008   ;;  %vm1477_vm10 = vcmask 195584   ;;  %vm1548_vm11 = vcmask 220160  }
  0x19   : > { %s2949_s7 = smov 12   ;;  %s2950_s8 = smov 15   ;;  %vm1924_vm12 = vcmask 261120  }
  0x1a   : > { %s2139_s27 = smul.u32 432, %s179_s26  ;;  %s2951_s9 = smov 18  }
  0x1b   : > { %s2952_s18 = smov 21   ;;  %s2954_s23 = smov 24  }
  0x1c   : > { %s3038_s30 = scalar_lea.vmem %s4537_s0, %s2139_s27  ;;  %s175_s28 = sand.u32 1, %s2928_s13  }
  0x1d   : > { %v3041_v0 = vld [vmem:[%s3038_s30 + $0x30] sm:$0xff]  ;;  %v3044_v1 = vld [vmem:[%s3038_s30 + $0x38] sm:$0xff]  ;;  %v3047_v2 = vld [vmem:[%s3038_s30 + $0x40] sm:$0x3]  ;;  %s2054_s29 = sshll.u32 %s175_s28, 8  ;;  %s2955_s10 = smov [#allocation2]  }
  0x1e   : > { %v301_v3 = vrot.slane %v3041_v0, 1  ;;  %v302_v4 = vrot.slane %v3044_v1, 1  ;;  %v304_v5 = vrot.slane %v3047_v2, 1  ;;  %v3053_v6 = vld [vmem:[%s3038_s30] sm:$0xff]  ;;  %v3056_v7 = vld [vmem:[%s3038_s30 + $0x8] sm:$0xff]  ;;  %v3067_v12 = vld [vmem:[%s3038_s30 + $0x50] sm:$0xff] }
  0x1f   : > { %v3059_v8 = vld [vmem:[%s3038_s30 + $0x10] sm:$0x3]  ;;  %v291_v9 = vrot.slane %v3053_v6, 1  ;;  %v292_v10 = vrot.slane %v3056_v7, 1  ;;  %v3064_v11 = vld [vmem:[%s3038_s30 + $0x48] sm:$0xff]  ;;  %v3076_v17 = vld [vmem:[%s3038_s30 + $0x18] sm:$0xff] }
  0x20   : > { %v303_v13 = vsel %vm290_vm0, %v301_v3, %v302_v4  ;;  %v305_v14 = vsel %vm290_vm0, %v302_v4, %v304_v5  ;;  %v294_v15 = vrot.slane %v3059_v8, 1  ;;  %v3073_v16 = vld [vmem:[%s3038_s30 + $0x58] sm:$0x3]  ;;  %v3079_v18 = vld [vmem:[%s3038_s30 + $0x20] sm:$0xff]  ;;  %v306_v21 = vrot.slane %v3064_v11, 1  ;;  %v3111_v36 = vld [vmem:[%s3038_s30 + $0x68] sm:$0xff] }
  0x21   : > { %v3081_v19 = vpack.i.bf16 %v305_v14, %v303_v13  ;;  %v293_v20 = vsel %vm290_vm0, %v291_v9, %v292_v10  ;;  %v307_v22 = vrot.slane %v3067_v12, 1  ;;  %v3087_v23 = vld [vmem:[%s3038_s30 + $0x28] sm:$0x3]  ;;  %v3090_v24 = vld [vmem:[%s3038_s30 + $0x78] sm:$0xff]  ;;  %v3093_v25 = vld [vmem:[%s3038_s30 + $0x80] sm:$0xff]  ;;  %v309_v27 = vrot.slane %v3073_v16, 1 }
  0x22   : > { %v295_v26 = vsel %vm290_vm0, %v292_v10, %v294_v15  ;;  %v296_v28 = vrot.slane %v3076_v17, 1  ;;  %v297_v29 = vrot.slane %v3079_v18, 1  ;;  %v3100_v30 = vld [vmem:[%s3038_s30 + $0x88] sm:$0x3]  ;;  %v3103_v31 = vld [vmem:[%s3038_s30 + $0x60] sm:$0xff]  ;;  %v299_v34 = vrot.slane %v3087_v23, 1 }
  0x23   : > { %4581 = vst [vmem:[#allocation5_spill] sm:$0xff] %v3081_v19  ;;  %2217 = vrot.lane.b32.xlu1 %v3081_v19, %s2946_s4  ;;  %v2206_v32 = vpack.i.bf16 %v295_v26, %v293_v20  ;;  %v308_v33 = vsel %vm290_vm0, %v306_v21, %v307_v22  ;;  %v316_v35 = vrot.slane %v3090_v24, 1  ;;  %v3114_v37 = vld [vmem:[%s3038_s30 + $0x70] sm:$0x3]  ;;  %v310_v38 = vsel %vm290_vm0, %v307_v22, %v309_v27  ;;  %v3121_v42 = vld [vmem:[%s3038_s30 + $0xa8] sm:$0xff]  ;;  %v3139_v50 = vld [vmem:[%s3038_s30 + $0x98] sm:$0xff] }
  0x24   : > { %v298_v39 = vsel %vm290_vm0, %v296_v28, %v297_v29  ;;  %v317_v40 = vrot.slane %v3093_v25, 1  ;;  %v319_v41 = vrot.slane %v3100_v30, 1  ;;  %v3124_v43 = vld [vmem:[%s3038_s30 + $0xb0] sm:$0xff]  ;;  %v3127_v44 = vpack.i.bf16 %v310_v38, %v308_v33  ;;  %v3133_v48 = vld [vmem:[%s3038_s30 + $0xb8] sm:$0x3]  ;;  %v3160_v61 = vld [vmem:[%s3038_s30 + $0xe0] sm:$0xff] }
  0x25   : > { %2207 = vrot.lane.b32.xlu0 %v2206_v32, %s2946_s4  ;;  %v300_v45 = vsel %vm290_vm0, %v297_v29, %v299_v34  ;;  %v311_v46 = vrot.slane %v3103_v31, 1  ;;  %v312_v47 = vrot.slane %v3111_v36, 1  ;;  %v3136_v49 = vld [vmem:[%s3038_s30 + $0x90] sm:$0xff]  ;;  %v314_v54 = vrot.slane %v3114_v37, 1  ;;  %v3147_v55 = vld [vmem:[%s3038_s30 + $0xa0] sm:$0x3] }
  0x26   : > { %4582 = vst [vmem:[#allocation6_spill] sm:$0xff] %v3127_v44  ;;  %v3141_v51 = vpack.i.bf16 %v300_v45, %v298_v39  ;;  %v318_v52 = vsel %vm290_vm0, %v316_v35, %v317_v40  ;;  %v320_v53 = vsel %vm290_vm0, %v317_v40, %v319_v41  ;;  %v3150_v56 = vld [vmem:[%s3038_s30 + $0xd8] sm:$0xff]  ;;  %v326_v59 = vrot.slane %v3121_v42, 1  ;;  %v3163_v62 = vld [vmem:[%s3038_s30 + $0xe8] sm:$0x3]  ;;  %v3170_v9 = vld [vmem:[%s3038_s30 + $0xc0] sm:$0xff] }
  0x27   : > { %2222 = vrot.lane.b32.xlu1 %v3127_v44, %s2946_s4  ;;  %v3154_v57 = vpack.i.bf16 %v320_v53, %v318_v52  ;;  %v313_v58 = vsel %vm290_vm0, %v311_v46, %v312_v47  ;;  %v327_v60 = vrot.slane %v3124_v43, 1  ;;  %v315_v63 = vsel %vm290_vm0, %v312_v47, %v314_v54  ;;  %v3173_v10 = vld [vmem:[%s3038_s30 + $0xc8] sm:$0xff]  ;;  %v3183_v21 = vld [vmem:[%s3038_s30 + $0xd0] sm:$0x3]  ;;  %v3203_v39 = vld [vmem:[%s3038_s30 + $0x118] sm:$0x3] }
  0x28   : > { %4583 = vst [vmem:[#allocation7_spill] sm:$0xff] %v3141_v51  ;;  %v329_v3 = vrot.slane %v3133_v48, 1  ;;  %v321_v4 = vrot.slane %v3136_v49, 1  ;;  %v322_v5 = vrot.slane %v3139_v50, 1  ;;  %v3177_v13 = vpack.i.bf16 %v315_v63, %v313_v58  ;;  %v3190_v29 = vld [vmem:[%s3038_s30 + $0x108] sm:$0xff]  ;;  %v3193_v32 = vld [vmem:[%s3038_s30 + $0x110] sm:$0xff] }
  0x29   : > { %4584 = vst [vmem:[#allocation8_spill] sm:$0xff] %v3154_v57  ;;  %2212 = vrot.lane.b32.xlu0 %v3141_v51, %s2946_s4  ;;  %v328_v14 = vsel %vm290_vm0, %v326_v59, %v327_v60  ;;  %v324_v15 = vrot.slane %v3147_v55, 1  ;;  %v336_v20 = vrot.slane %v3150_v56, 1  ;;  %v337_v27 = vrot.slane %v3160_v61, 1  ;;  %v3206_v40 = vld [vmem:[%s3038_s30 + $0xf0] sm:$0xff]  ;;  %v3209_v41 = vld [vmem:[%s3038_s30 + $0xf8] sm:$0xff] }
  0x2a   : > { %4585 = vst [vmem:[#allocation9_spill] sm:$0xff] %v3177_v13  ;;  %v330_v22 = vsel %vm290_vm0, %v327_v60, %v329_v3  ;;  %v323_v26 = vsel %vm290_vm0, %v321_v4, %v322_v5  ;;  %v339_v28 = vrot.slane %v3163_v62, 1  ;;  %v331_v35 = vrot.slane %v3170_v9, 1  ;;  %v3215_v52 = vld [vmem:[%s3038_s30 + $0x100] sm:$0x3]  ;;  %v3225_v60 = vld [vmem:[%s3038_s30 + $0x138] sm:$0xff] }
  0x2b   : > { %2232 = vrot.lane.b32.xlu1 %v3154_v57, %s2946_s4  ;;  %v3197_v33 = vpack.i.bf16 %v330_v22, %v328_v14  ;;  %v325_v34 = vsel %vm290_vm0, %v322_v5, %v324_v15  ;;  %v332_v38 = vrot.slane %v3173_v10, 1  ;;  %v338_v45 = vsel %vm290_vm0, %v336_v20, %v337_v27  ;;  %v3228_v63 = vld [vmem:[%s3038_s30 + $0x140] sm:$0xff]  ;;  %v3231_v3 = vld [vmem:[%s3038_s30 + $0x148] sm:$0x3]  ;;  %s2870_s11 = sshll.u32 %s2955_s10, 4  ;;  %s2871_s11 = int_to_ptr.vmem [resolvable:$false] %s2870_s11 }
  0x2c   : > { %v340_v46 = vsel %vm290_vm0, %v337_v27, %v339_v28  ;;  %v334_v47 = vrot.slane %v3183_v21, 1  ;;  %v3219_v53 = vpack.i.bf16 %v325_v34, %v323_v26  ;;  %v346_v58 = vrot.slane %v3190_v29, 1  ;;  %v3238_v20 = vld [vmem:[%s3038_s30 + $0x120] sm:$0xff]  ;;  %v3241_v22 = vld [vmem:[%s3038_s30 + $0x128] sm:$0xff]  ;;  %v3250_v34 = vld [vmem:[%s3038_s30 + $0x130] sm:$0x3] }
  0x2d   : > { %4586 = vst [vmem:[#allocation10_spill] sm:$0xff] %v3197_v33  ;;  %2227 = vrot.lane.b32.xlu0 %v3177_v13, %s2946_s4  ;;  %v333_v54 = vsel %vm290_vm0, %v331_v35, %v332_v38  ;;  %v347_v59 = vrot.slane %v3193_v32, 1  ;;  %v349_v5 = vrot.slane %v3203_v39, 1  ;;  %v341_v14 = vrot.slane %v3206_v40, 1  ;;  %4588 = vst [vmem:[#allocation12_spill] sm:$0xff] %v3238_v20  ;;  %v3257_v13 = vld [vmem:[%s3038_s30 + $0x168] sm:$0xff] }
  0x2e   : > { %4587 = vst [vmem:[#allocation11_spill] sm:$0xff] %v3219_v53  ;;  %v335_v4 = vsel %vm290_vm0, %v332_v38, %v334_v47  ;;  %v342_v15 = vrot.slane %v3209_v41, 1  ;;  %4589 = vst [vmem:[#allocation13_spill] sm:$0xff] %v3241_v22  ;;  %v3245_v26 = vpack.i.bf16 %v340_v46, %v338_v45  ;;  %v344_v28 = vrot.slane %v3215_v52, 1  ;;  %v3260_v45 = vld [vmem:[%s3038_s30 + $0x170] sm:$0xff] }
  0x2f   : > { %2242 = vrot.lane.b32.xlu1 %v3197_v33, %s2946_s4  ;;  %v348_v27 = vsel %vm290_vm0, %v346_v58, %v347_v59  ;;  %4591 = vst [vmem:[#allocation15_spill] sm:$0xff] %v3250_v34  ;;  %v350_v35 = vsel %vm290_vm0, %v347_v59, %v349_v5  ;;  %v356_v38 = vrot.slane %v3225_v60, 1  ;;  %v357_v47 = vrot.slane %v3228_v63, 1  ;;  %4592 = vst [vmem:[#allocation16_spill] sm:$0xff] %v3257_v13  ;;  %v3269_v5 = vld [vmem:[%s3038_s30 + $0x178] sm:$0x3] }
  0x30   : > { %4590 = vst [vmem:[#allocation14_spill] sm:$0xff] %v3245_v26  ;;  %v359_v57 = vrot.slane %v3231_v3, 1  ;;  %4593 = vst [vmem:[#allocation17_spill] sm:$0xff] %v3260_v45  ;;  %v3264_v46 = vpack.i.bf16 %v335_v4, %v333_v54  ;;  %v351_v58 = vrot.slane %v3238_v20, 1  ;;  %v352_v59 = vrot.slane %v3241_v22, 1  ;;  %v3284_v22 = vld [vmem:[%s3038_s30 + $0x158] sm:$0xff] }
  0x31   : > { %2237 = vrot.lane.b32.xlu0 %v3219_v53, %s2946_s4  ;;  %v343_v33 = vsel %vm290_vm0, %v341_v14, %v342_v15  ;;  %v345_v44 = vsel %vm290_vm0, %v342_v15, %v344_v28  ;;  %v354_v19 = vrot.slane %v3250_v34, 1  ;;  %v3276_v51 = vpack.i.bf16 %v350_v35, %v348_v27  ;;  %v3281_v53 = vld [vmem:[%s3038_s30 + $0x150] sm:$0xff]  ;;  %v3287_v20 = vld [vmem:[%s3038_s30 + $0x160] sm:$0x3] }
  0x32   : > { %4594 = vst [vmem:[#allocation18_spill] sm:$0xff] %v3264_v46  ;;  %v366_v54 = vrot.slane %v3257_v13, 1  ;;  %v367_v4 = vrot.slane %v3260_v45, 1  ;;  %v358_v14 = vsel %vm290_vm0, %v356_v38, %v357_v47  ;;  %v360_v15 = vsel %vm290_vm0, %v357_v47, %v359_v57 }
  0x33   : > { %2252 = vrot.lane.b32.xlu1 %v3245_v26, %s2946_s4  ;;  %v369_v28 = vrot.slane %v3269_v5, 1  ;;  %v3294_v27 = vpack.i.bf16 %v345_v44, %v343_v33  ;;  %v353_v35 = vsel %vm290_vm0, %v351_v58, %v352_v59  ;;  %v355_v26 = vsel %vm290_vm0, %v352_v59, %v354_v19 }
  0x34   : > { %v361_v45 = vrot.slane %v3281_v53, 1  ;;  %v362_v13 = vrot.slane %v3284_v22, 1  ;;  %v364_v34 = vrot.slane %v3287_v20, 1  ;;  %v3303_v57 = vpack.i.bf16 %v360_v15, %v358_v14 }
  0x35   : > { %2247 = vrot.lane.b32.xlu0 %v3264_v46, %s2946_s4  ;;  %v368_v38 = vsel %vm290_vm0, %v366_v54, %v367_v4  ;;  %v370_v44 = vsel %vm290_vm0, %v367_v4, %v369_v28  ;;  %v377_v33 = vrot.slane %v3076_v17, 2  ;;  %v378_v47 = vrot.slane %v3079_v18, 2 }
  0x36   : > { %v380_v19 = vrot.slane %v3087_v23, 2  ;;  %v3312_v58 = vpack.i.bf16 %v355_v26, %v353_v35  ;;  %v372_v59 = vrot.slane %v3053_v6, 2  ;;  %v373_v14 = vrot.slane %v3056_v7, 2 }
  0x37   : > { %2262 = vrot.lane.b32.xlu1 %v3276_v51, %s2946_s4  ;;  %v375_v54 = vrot.slane %v3059_v8, 2  ;;  %v363_v4 = vsel %vm290_vm0, %v361_v45, %v362_v13  ;;  %v365_v15 = vsel %vm290_vm0, %v362_v13, %v364_v34  ;;  %v3321_v23 = vpack.i.bf16 %v370_v44, %v368_v38 }
  0x38   : > { %v387_v28 = vrot.slane %v3064_v11, 2  ;;  %v388_v26 = vrot.slane %v3067_v12, 2  ;;  %v390_v35 = vrot.slane %v3073_v16, 2  ;;  %v385_v6 = vrot.slane %v3047_v2, 2 }
  0x39   : > { %2257 = vrot.lane.b32.xlu0 %v3294_v27, %s2946_s4  ;;  %4595 = vst [vmem:[#allocation19_spill] sm:$0xff] %v3321_v23  ;;  %v379_v7 = vsel %vm371_vm1, %v377_v33, %v378_v47  ;;  %v381_v8 = vsel %vm371_vm1, %v378_v47, %v380_v19  ;;  %v3331_v13 = vpack.i.bf16 %v365_v15, %v363_v4  ;;  %v382_v45 = vrot.slane %v3041_v0, 2 }
  0x3a   : > { %v374_v34 = vsel %vm371_vm1, %v372_v59, %v373_v14  ;;  %v383_v38 = vrot.slane %v3044_v1, 2  ;;  %v376_v44 = vsel %vm371_vm1, %v373_v14, %v375_v54  ;;  %v397_v16 = vrot.slane %v3090_v24, 2 }
  0x3b   : > { %2272 = vrot.lane.b32.xlu1 %v3303_v57, %s2946_s4  ;;  %4596 = vst [vmem:[#allocation20_spill] sm:$0xff] %v3331_v13  ;;  %v398_v2 = vrot.slane %v3093_v25, 2  ;;  %v400_v33 = vrot.slane %v3100_v30, 2  ;;  %v3342_v47 = vpack.i.bf16 %v381_v8, %v379_v7  ;;  %v389_v19 = vsel %vm371_vm1, %v387_v28, %v388_v26 }
  0x3c   : > { %v391_v59 = vsel %vm371_vm1, %v388_v26, %v390_v35  ;;  %v392_v4 = vrot.slane %v3103_v31, 2  ;;  %v393_v15 = vrot.slane %v3111_v36, 2  ;;  %v395_v14 = vrot.slane %v3114_v37, 2 }
  0x3d   : > { %2267 = vrot.lane.b32.xlu0 %v3312_v58, %s2946_s4  ;;  %v2286_v54 = vpack.i.bf16 %v376_v44, %v374_v34  ;;  %v384_v30 = vsel %vm371_vm1, %v382_v45, %v383_v38  ;;  %v386_v46 = vsel %vm371_vm1, %v383_v38, %v385_v6  ;;  %v3353_v7 = vpack.i.bf16 %v391_v59, %v389_v19 }
  0x3e   : > { %v399_v28 = vsel %vm371_vm1, %v397_v16, %v398_v2  ;;  %v401_v26 = vsel %vm371_vm1, %v398_v2, %v400_v33  ;;  %v407_v35 = vrot.slane %v3121_v42, 2  ;;  %v408_v37 = vrot.slane %v3124_v43, 2 }
  0x3f   : > { %2282 = vrot.lane.b32.xlu1 %v3321_v23, %s2946_s4  ;;  %v410_v8 = vrot.slane %v3133_v48, 2  ;;  %v402_v34 = vrot.slane %v3136_v49, 2  ;;  %v403_v6 = vrot.slane %v3139_v50, 2  ;;  %v394_v45 = vsel %vm371_vm1, %v392_v4, %v393_v15 }
  0x40   : > { %v396_v38 = vsel %vm371_vm1, %v393_v15, %v395_v14  ;;  %v405_v44 = vrot.slane %v3147_v55, 2  ;;  %v3368_v16 = vpack.i.bf16 %v386_v46, %v384_v30  ;;  %v417_v2 = vrot.slane %v3150_v56, 2 }
  0x41   : > { %2277 = vrot.lane.b32.xlu0 %v3331_v13, %s2946_s4  ;;  %v418_v33 = vrot.slane %v3160_v61, 2  ;;  %v420_v48 = vrot.slane %v3163_v62, 2  ;;  %v3373_v19 = vpack.i.bf16 %v401_v26, %v399_v28  ;;  %v3377_v59 = vpack.i.bf16 %v396_v38, %v394_v45  ;;  %s2080_s4 = sshll.u32 %s2936_s15, 12 }
  0x42   : > { %v409_v4 = vsel %vm371_vm1, %v407_v35, %v408_v37  ;;  %v411_v55 = vsel %vm371_vm1, %v408_v37, %v410_v8  ;;  %v404_v46 = vsel %vm371_vm1, %v402_v34, %v403_v6  ;;  %v406_v15 = vsel %vm371_vm1, %v403_v6, %v405_v44 }
  0x43   : > { %2292 = vrot.lane.b32.xlu1 %v3342_v47, %s2947_s5  ;;  %v412_v14 = vrot.slane %v3170_v9, 2  ;;  %v415_v62 = vrot.slane %v3183_v21, 2  ;;  %v419_v30 = vsel %vm371_vm1, %v417_v2, %v418_v33  ;;  %v421_v28 = vsel %vm371_vm1, %v418_v33, %v420_v48 }
  0x44   : > { %v427_v26 = vrot.slane %v3190_v29, 2  ;;  %v428_v35 = vrot.slane %v3193_v32, 2  ;;  %v430_v37 = vrot.slane %v3203_v39, 2  ;;  %v422_v8 = vrot.slane %v3206_v40, 2 }
  0x45   : > { %2287 = vrot.lane.b32.xlu0 %v2286_v54, %s2947_s5  ;;  %v413_v54 = vrot.slane %v3173_v10, 2  ;;  %v423_v34 = vrot.slane %v3209_v41, 2  ;;  %v425_v6 = vrot.slane %v3215_v52, 2  ;;  %v3398_v21 = vpack.i.bf16 %v411_v55, %v409_v4 }
  0x46   : > { %v437_v45 = vrot.slane %v3225_v60, 2  ;;  %v438_v38 = vrot.slane %v3228_v63, 2  ;;  %v440_v44 = vrot.slane %v3231_v3, 2  ;;  %v3403_v2 = vpack.i.bf16 %v406_v15, %v404_v46  ;;  %v4598_v3 = vld [vmem:[#allocation12_spill] sm:$0xff] }
  0x47   : > { %2302 = vrot.lane.b32.xlu1 %v3353_v7, %s2947_s5  ;;  %4597 = vst [vmem:[#allocation21_spill] sm:$0xff] %v3398_v21  ;;  %v3407_v39 = vpack.i.bf16 %v421_v28, %v419_v30  ;;  %v414_v52 = vsel %vm371_vm1, %v412_v14, %v413_v54  ;;  %v416_v33 = vsel %vm371_vm1, %v413_v54, %v415_v62  ;;  %v432_v46 = vrot.slane %v4598_v3, 2  ;;  %v4599_v14 = vld [vmem:[#allocation13_spill] sm:$0xff]  ;;  %v4600_v54 = vld [vmem:[#allocation15_spill] sm:$0xff] }
  0x48   : > { %v429_v48 = vsel %vm371_vm1, %v427_v26, %v428_v35  ;;  %v431_v4 = vsel %vm371_vm1, %v428_v35, %v430_v37  ;;  %v424_v55 = vsel %vm371_vm1, %v422_v8, %v423_v34  ;;  %v426_v23 = vsel %vm371_vm1, %v423_v34, %v425_v6  ;;  %v4601_v26 = vld [vmem:[#allocation16_spill] sm:$0xff]  ;;  %v4602_v35 = vld [vmem:[#allocation17_spill] sm:$0xff] }
  0x49   : > { %2297 = vrot.lane.b32.xlu0 %v3368_v16, %s2947_s5  ;;  %v439_v15 = vsel %vm371_vm1, %v437_v45, %v438_v38  ;;  %v441_v30 = vsel %vm371_vm1, %v438_v38, %v440_v44  ;;  %v433_v28 = vrot.slane %v4599_v14, 2  ;;  %v435_v62 = vrot.slane %v4600_v54, 2 }
  0x4a   : > { %v447_v13 = vrot.slane %v4601_v26, 2  ;;  %v448_v37 = vrot.slane %v4602_v35, 2  ;;  %v3426_v8 = vpack.i.bf16 %v416_v33, %v414_v52  ;;  %v450_v34 = vrot.slane %v3269_v5, 2 }
  0x4b   : > { %2312 = vrot.lane.b32.xlu1 %v3373_v19, %s2947_s5  ;;  %v3429_v6 = vpack.i.bf16 %v431_v4, %v429_v48  ;;  %v3431_v45 = vpack.i.bf16 %v426_v23, %v424_v55  ;;  %v3433_v38 = vpack.i.bf16 %v441_v30, %v439_v15  ;;  %v434_v44 = vsel %vm371_vm1, %v432_v46, %v433_v28 }
  0x4c   : > { %v436_v54 = vsel %vm371_vm1, %v433_v28, %v435_v62  ;;  %v442_v52 = vrot.slane %v3281_v53, 2  ;;  %v451_v5 = vsel %vm371_vm1, %v448_v37, %v450_v34  ;;  %v443_v23 = vrot.slane %v3284_v22, 2 }
  0x4d   : > { %2307 = vrot.lane.b32.xlu0 %v3377_v59, %s2947_s5  ;;  %v445_v33 = vrot.slane %v3287_v20, 2  ;;  %v3450_v48 = vpack.i.bf16 %v436_v54, %v434_v44  ;;  %v2371_v46 = vpack.i.bf16 %v3044_v1, %v3041_v0  ;;  %v2366_v15 = vpack.i.bf16 %v3079_v18, %v3076_v17 }
  0x4e   : > { %v2376_v30 = vpack.i.bf16 %v3067_v12, %v3064_v11  ;;  %v3482_v0 = vpack.i.bf16 %v3139_v50, %v3136_v49  ;;  %v3487_v1 = vpack.i.bf16 %v3093_v25, %v3090_v24  ;;  %v2401_v11 = vpack.i.bf16 %v3173_v10, %v3170_v9 }
  0x4f   : > { %2322 = vrot.lane.b32.xlu1 %v3398_v21, %s2947_s5  ;;  %v449_v21 = vsel %vm371_vm1, %v447_v13, %v448_v37  ;;  %v444_v13 = vsel %vm371_vm1, %v442_v52, %v443_v23  ;;  %v446_v4 = vsel %vm371_vm1, %v443_v23, %v445_v33  ;;  %v2396_v12 = vpack.i.bf16 %v3124_v43, %v3121_v42  ;;  %v4603_v33 = vld [vmem:[#allocation14_spill] sm:$0xff] }
  0x50   : > { %v3456_v55 = vpack.i.bf16 %v451_v5, %v449_v21  ;;  %v3460_v20 = vpack.i.bf16 %v446_v4, %v444_v13  ;;  %v3473_v21 = vpack.i.bf16 %v3111_v36, %v3103_v31  ;;  %v2411_v17 = vpack.i.bf16 %v3209_v41, %v3206_v40  ;;  %v236_v41 = vld [vmem:[%s3038_s30 + $0x180] sm:$0xff]  ;;  %v4604_v4 = vld [vmem:[#allocation7_spill] sm:$0xff] }
  0x51   : > { %2317 = vrot.lane.b32.xlu0 %v3403_v2, %s2947_s5  ;;  %v2406_v18 = vpack.i.bf16 %v3160_v61, %v3150_v56  ;;  %v3506_v9 = vpack.i.bf16 %v4599_v14, %v4598_v3  ;;  %v2416_v10 = vpack.i.bf16 %v3193_v32, %v3190_v29  ;;  %v3515_v40 = vpack.i.bf16 %v3284_v22, %v3281_v53  ;;  %v237_v56 = vld [vmem:[%s3038_s30 + $0x188] sm:$0xff]  ;;  %v238_v32 = vld [vmem:[%s3038_s30 + $0x190] sm:$0x3] }
  0x52   : > { %v3522_v61 = vpack.i.bf16 %v3228_v63, %v3225_v60  ;;  %v456_v28 = vrot.slane %v237_v56, 1  ;;  %v455_v62 = vrot.slane %v236_v41, 1  ;;  %v3526_v29 = vpack.i.bf16 %v237_v56, %v236_v41 }
  0x53   : > { %2332 = vrot.lane.b32.xlu1 %v3407_v39, %s2947_s5  ;;  %v458_v37 = vrot.slane %v238_v32, 1  ;;  %v3533_v34 = vpack.i.bf16 %v4602_v35, %v4601_v26  ;;  %v461_v5 = vrot.slane %v237_v56, 2  ;;  %v460_v23 = vrot.slane %v236_v41, 2 }
  0x54   : > { %v457_v44 = vsel %vm290_vm0, %v455_v62, %v456_v28  ;;  %v463_v13 = vrot.slane %v238_v32, 2 }
  0x55   : > { %2327 = vrot.lane.b32.xlu0 %v3426_v8, %s2947_s5  ;;  %v459_v54 = vsel %vm290_vm0, %v456_v28, %v458_v37 }
  0x56   : > { %v3539_v52 = vpack.i.bf16 %v459_v54, %v457_v44 }
  0x57   : > { %2342 = vrot.lane.b32.xlu1 %v3429_v6, %s2947_s5 }
  0x59   : > { %2337 = vrot.lane.b32.xlu0 %v3431_v45, %s2947_s5 }
  0x5b   : > { %2352 = vrot.lane.b32.xlu1 %v3433_v38, %s2947_s5 }
  0x5d   : > { %2347 = vrot.lane.b32.xlu0 %v3450_v48, %s2947_s5 }
  0x5f   : > { %2362 = vrot.lane.b32.xlu1 %v3456_v55, %s2947_s5 }
  0x61   : > { %2357 = vrot.lane.b32.xlu0 %v3460_v20, %s2947_s5 }
  0x63   : > { %2372 = vrot.lane.b32.xlu1 %v2371_v46, %s2948_s6 }
  0x65   : > { %2367 = vrot.lane.b32.xlu0 %v2366_v15, %s2948_s6  ;;  %v462_v15 = vsel %vm371_vm1, %v460_v23, %v461_v5 }
  0x67   : > { %2382 = vrot.lane.b32.xlu1 %v3473_v21, %s2948_s6 }
  0x69   : > { %2377 = vrot.lane.b32.xlu0 %v2376_v30, %s2948_s6 }
  0x6b   : > { %2392 = vrot.lane.b32.xlu1 %v3482_v0, %s2948_s6 }
  0x6d   : > { %2387 = vrot.lane.b32.xlu0 %v3487_v1, %s2948_s6 }
  0x6f   : > { %2402 = vrot.lane.b32.xlu1 %v2401_v11, %s2948_s6  ;;  %v464_v11 = vsel %vm371_vm1, %v461_v5, %v463_v13 }
  0x71   : > { %2397 = vrot.lane.b32.xlu0 %v2396_v12, %s2948_s6  ;;  %v3551_v12 = vpack.i.bf16 %v464_v11, %v462_v15  ;;  %v4611_v11 = vld [vmem:[#allocation9_spill] sm:$0xff] }
  0x73   : > { %2412 = vrot.lane.b32.xlu1 %v2411_v17, %s2948_s6 }
  0x75   : > { %2407 = vrot.lane.b32.xlu0 %v2406_v18, %s2948_s6  ;;  %v4605_v18 = vld [vmem:[#allocation5_spill] sm:$0xff] }
  0x77   : > { %2422 = vrot.lane.b32.xlu1 %v3506_v9, %s2948_s6 }
  0x79   : > { %2417 = vrot.lane.b32.xlu0 %v2416_v10, %s2948_s6 }
  0x7b   : > { %2432 = vrot.lane.b32.xlu1 %v3515_v40, %s2948_s6 }
  0x7d   : > { %2427 = vrot.lane.b32.xlu0 %v3522_v61, %s2948_s6 }
  0x7f   : > { %2442 = vrot.lane.b32.xlu1 %v3526_v29, %s2948_s6 }
  0x81   : > { %2437 = vrot.lane.b32.xlu0 %v3533_v34, %s2948_s6 }
  0x83   : > { %2452 = vrot.lane.b32.xlu1 %v4603_v33, %s2949_s7 }
  0x85   : > { %2447 = vrot.lane.b32.xlu0 %v4604_v4, %s2949_s7 }
  0x87   : > { %2462 = vrot.lane.b32.xlu1 %v3294_v27, %s2949_s7 }
  0x89   : > { %2457 = vrot.lane.b32.xlu0 %v4605_v18, %s2949_s7 }
  0x8b   : > { %2472 = vrot.lane.b32.xlu1 %v3407_v39, %s2950_s8 }
  0x8d   : > { %2467 = vrot.lane.b32.xlu0 %v3342_v47, %s2950_s8  ;;  %v2846_v47 = vld [vmem:[%s4538_s1] sm:$0xff]  }
  0x8e   : > { %2099 = vmatprep.subr.bf16.mxu0 %v2846_v47  ;;  %2135 = vmatprep.subr.bf16.mxu1 %v2846_v47 }
  0x8f   : > { %2482 = vrot.lane.b32.xlu1 %v3431_v45, %s2950_s8  ;;  %2100 = vmatpush3.bf16.msra.mxu0 %v2846_v47 }
  0x90   : > { %2137 = vmatpush3.bf16.msra.mxu1 %v2846_v47 }
  0x91   : > { %2477 = vrot.lane.b32.xlu0 %v3368_v16, %s2950_s8 }
  0x93   : > { %2492 = vrot.lane.b32.xlu1 %v2411_v17, %s2951_s9 }
  0x95   : > { %2487 = vrot.lane.b32.xlu0 %v2371_v46, %s2951_s9  ;;  %v3565_v41 = vpop.permute.xlu1 %2217  ;;  %v2847_v46 = vld [vmem:[%s4538_s1 + $0x8] sm:$0x3f]  }
  0x96   : > { %4606 = vst [vmem:[#allocation12_spill] sm:$0xff] %v3565_v41 }
  0x97   : > { %v3567_v56 = vpop.permute.xlu0 %2207  ;;  %2502 = vrot.lane.b32.xlu1 %v2416_v10, %s2951_s9  ;;  %v2953_v10 = vmov 65535  }
  0x98   : > { %v1598_v62 = vsel %vm1597_vm2, 4294967295, %v2953_v10 }
  0x99   : > { %2497 = vrot.lane.b32.xlu0 %v2376_v30, %s2951_s9  ;;  %v3574_v28 = vpop.permute.xlu1 %2222  ;;  %v1599_v32 = vsel %vm371_vm1, %v1598_v62, 0 }
  0x9a   : > { %4607 = vst [vmem:[#allocation13_spill] sm:$0xff] %v3574_v28  ;;  %v1601_v44 = vand.u32 %v2847_v46, %v1599_v32 }
  0x9b   : > { %v3576_v17 = vpop.permute.xlu0 %2212  ;;  %2512 = vrot.lane.b32.xlu1 %v3294_v27, %s2952_s18  ;;  %v4608_v27 = vld [vmem:[#allocation6_spill] sm:$0xff] }
  0x9c   : > { %2101 = vmatprep.subr.bf16.mxu0 %v1601_v44  ;;  %2136 = vmatprep.subr.bf16.mxu1 %v1601_v44 }
  0x9d   : > { %2507 = vrot.lane.b32.xlu0 %v4605_v18, %s2952_s18  ;;  %v2233_v30 = vpop.permute.xlu1 %2232  ;;  %2102 = vmatpush3.bf16.msra.mxu0 %v1601_v44 }
  0x9e   : > { %2138 = vmatpush3.bf16.msra.mxu1 %v1601_v44  ;;  %v2235_v62 = vunpack.i.h.bf16 %v2233_v30  ;;  %v2234_v32 = vunpack.i.l.bf16 %v2233_v30 }
  0x9f   : > { %v2228_v37 = vpop.permute.xlu0 %2227  ;;  %2522 = vrot.lane.b32.xlu1 %v3276_v51, %s2952_s18 }
  0xa0   : > { %v1257_v30 = vsel %vm1246_vm3, %v3090_v24, %v2234_v32 }
  0xa1   : > { %2517 = vrot.lane.b32.xlu0 %v4608_v27, %s2952_s18  ;;  %v3590_v54 = vpop.permute.xlu1 %2242 }
  0xa3   : > { %v3592_v5 = vpop.permute.xlu0 %2237  ;;  %2532 = vrot.lane.b32.xlu1 %v3431_v45, %s2954_s23 }
  0xa5   : > { %2527 = vrot.lane.b32.xlu0 %v3368_v16, %s2954_s23  ;;  %v3598_v23 = vpop.permute.xlu1 %2252 }
  0xa7   : > { %v3600_v13 = vpop.permute.xlu0 %2247  ;;  %2542 = vrot.lane.b32.xlu1 %v3429_v6, %s2954_s23 }
  0xa9   : > { %2537 = vrot.lane.b32.xlu0 %v3353_v7, %s2954_s23  ;;  %v3606_v4 = vpop.permute.xlu1 %2262 }
  0xaa   : > { %4609 = vst [vmem:[#allocation15_spill] sm:$0xff] %v3606_v4 }
  0xab   : > { %v3608_v15 = vpop.permute.xlu0 %2257  ;;  %2552 = vrot.lane.b32.xlu1 %v3276_v51, %s2949_s7 }
  0xac   : > { %4610 = vst [vmem:[#allocation16_spill] sm:$0xff] %v3608_v15 }
  0xad   : > { %2547 = vrot.lane.b32.xlu0 %v4608_v27, %s2949_s7  ;;  %v3614_v16 = vpop.permute.xlu1 %2272 }
  0xaf   : > { %v3616_v45 = vpop.permute.xlu0 %2267  ;;  %2562 = vrot.lane.b32.xlu1 %v3312_v58, %s2949_s7 }
  0xb1   : > { %2557 = vrot.lane.b32.xlu0 %v4611_v11, %s2949_s7  ;;  %v3622_v18 = vpop.permute.xlu1 %2282 }
  0xb3   : > { %v3624_v47 = vpop.permute.xlu0 %2277  ;;  %2572 = vrot.lane.b32.xlu1 %v3429_v6, %s2950_s8  ;;  %v2229_v6 = vunpack.i.l.bf16 %v2228_v37 }
  0xb5   : > { %2567 = vrot.lane.b32.xlu0 %v3353_v7, %s2950_s8  ;;  %v3630_v51 = vpop.permute.xlu1 %2292  ;;  %v2230_v7 = vunpack.i.h.bf16 %v2228_v37  ;;  %v1255_v24 = vsel %vm1246_vm3, %v3103_v31, %v2229_v6 }
  0xb7   : > { %v3632_v46 = vpop.permute.xlu0 %2287  ;;  %2582 = vrot.lane.b32.xlu1 %v3450_v48, %s2950_s8 }
  0xb9   : > { %2577 = vrot.lane.b32.xlu0 %v3377_v59, %s2950_s8  ;;  %v3638_v10 = vpop.permute.xlu1 %2302 }
  0xba   : > { %4612 = vst [vmem:[#allocation17_spill] sm:$0xff] %v3638_v10  ;;  %v1258_v10 = vsel %vm1246_vm3, %v3093_v25, %v2235_v62  ;;  %v1256_v25 = vsel %vm1246_vm3, %v3111_v36, %v2230_v7  ;;  %v2239_v62 = vunpack.i.l.bf16 %v3592_v5 }
  0xbb   : > { %v3640_v44 = vpop.permute.xlu0 %2297  ;;  %2592 = vrot.lane.b32.xlu1 %v3506_v9, %s2951_s9  ;;  %v2244_v9 = vunpack.i.l.bf16 %v3590_v54 }
  0xbc   : > { %4613 = vst [vmem:[#allocation14_spill] sm:$0xff] %v3640_v44  ;;  %v2245_v44 = vunpack.i.h.bf16 %v3590_v54  ;;  %v2240_v54 = vunpack.i.h.bf16 %v3592_v5 }
  0xbd   : > { %2587 = vrot.lane.b32.xlu0 %v3473_v21, %s2951_s9  ;;  %v2313_v27 = vpop.permute.xlu1 %2312  ;;  %v1261_v31 = vsel %vm1246_vm3, %v3121_v42, %v2244_v9  ;;  %v2274_v9 = vunpack.i.l.bf16 %v3614_v16 }
  0xbe   : > { %v2315_v15 = vunpack.i.h.bf16 %v2313_v27  ;;  %v2314_v4 = vunpack.i.l.bf16 %v2313_v27  ;;  %v1262_v36 = vsel %vm1246_vm3, %v3124_v43, %v2245_v44  ;;  %v1260_v6 = vsel %vm1246_vm3, %v3139_v50, %v2240_v54  ;;  %v4614_v50 = vld [vmem:[#allocation8_spill] sm:$0xff] }
  0xbf   : > { %v2308_v28 = vpop.permute.xlu0 %2307  ;;  %2602 = vrot.lane.b32.xlu1 %v3522_v61, %s2951_s9  ;;  %v1259_v43 = vsel %vm1246_vm3, %v3136_v49, %v2239_v62 }
  0xc0   : > { %v3655_v21 = vsel %vm1279_vm4, %v1258_v10, %v2315_v15  ;;  %v3658_v37 = vsel %vm1279_vm4, %v1257_v30, %v2314_v4  ;;  %v2310_v27 = vunpack.i.h.bf16 %v2308_v28  ;;  %v2309_v41 = vunpack.i.l.bf16 %v2308_v28 }
  0xc1   : > { %2597 = vrot.lane.b32.xlu0 %v3487_v1, %s2951_s9  ;;  %v2323_v61 = vpop.permute.xlu1 %2322 }
  0xc2   : > { %v3669_v15 = vsel %vm1279_vm4, %v1255_v24, %v2309_v41  ;;  %v3672_v4 = vsel %vm1279_vm4, %v1256_v25, %v2310_v27  ;;  %v2325_v28 = vunpack.i.h.bf16 %v2323_v61  ;;  %v2324_v10 = vunpack.i.l.bf16 %v2323_v61 }
  0xc3   : > { %v2318_v32 = vpop.permute.xlu0 %2317  ;;  %2612 = vrot.lane.b32.xlu1 %v3312_v58, %s2952_s18  ;;  %v2270_v25 = vunpack.i.h.bf16 %v3616_v45  ;;  %v2269_v24 = vunpack.i.l.bf16 %v3616_v45 }
  0xc4   : > { %v3681_v1 = vsel %vm1279_vm4, %v1262_v36, %v2325_v28  ;;  %v3684_v41 = vsel %vm1279_vm4, %v1261_v31, %v2324_v10  ;;  %v2320_v5 = vunpack.i.h.bf16 %v2318_v32  ;;  %v2319_v7 = vunpack.i.l.bf16 %v2318_v32 }
  0xc5   : > { %2607 = vrot.lane.b32.xlu0 %v4611_v11, %s2952_s18  ;;  %v3692_v42 = vpop.permute.xlu1 %2332  ;;  %v2275_v11 = vunpack.i.h.bf16 %v3614_v16  ;;  %v1273_v16 = vsel %vm1246_vm3, %v3225_v60, %v2274_v9  ;;  %v2285_v10 = vunpack.i.h.bf16 %v3622_v18  ;;  %v1271_v60 = vsel %vm1246_vm3, %v4598_v3, %v2269_v24 }
  0xc6   : > { %v3695_v58 = vsel %vm1279_vm4, %v1259_v43, %v2319_v7  ;;  %v3698_v44 = vsel %vm1279_vm4, %v1260_v6, %v2320_v5  ;;  %v2279_v5 = vunpack.i.l.bf16 %v3624_v47 }
  0xc7   : > { %v3700_v30 = vpop.permute.xlu0 %2327  ;;  %2622 = vrot.lane.b32.xlu1 %v3303_v57, %s2952_s18  ;;  %v1274_v28 = vsel %vm1246_vm3, %v3228_v63, %v2275_v11  ;;  %v1272_v63 = vsel %vm1246_vm3, %v4599_v14, %v2270_v25  ;;  %v1278_v14 = vsel %vm1246_vm3, %v4602_v35, %v2285_v10  ;;  %v4615_v10 = vld [vmem:[#allocation20_spill] sm:$0xff] }
  0xc8   : > { %v1275_v35 = vsel %vm1246_vm3, %v3281_v53, %v2279_v5 }
  0xc9   : > { %2617 = vrot.lane.b32.xlu0 %v4614_v50, %s2952_s18  ;;  %v3706_v49 = vpop.permute.xlu1 %2342 }
  0xcb   : > { %v3710_v27 = vpop.permute.xlu0 %2337  ;;  %2632 = vrot.lane.b32.xlu1 %v3450_v48, %s2954_s23  ;;  %v2284_v48 = vunpack.i.l.bf16 %v3622_v18  ;;  %v2280_v18 = vunpack.i.h.bf16 %v3624_v47 }
  0xcd   : > { %2627 = vrot.lane.b32.xlu0 %v3377_v59, %s2954_s23  ;;  %v2353_v54 = vpop.permute.xlu1 %2352  ;;  %v1277_v3 = vsel %vm1246_vm3, %v4601_v26, %v2284_v48 }
  0xce   : > { %v2355_v62 = vunpack.i.h.bf16 %v2353_v54  ;;  %v2354_v61 = vunpack.i.l.bf16 %v2353_v54 }
  0xcf   : > { %v2348_v36 = vpop.permute.xlu0 %2347  ;;  %2642 = vrot.lane.b32.xlu1 %v3433_v38, %s2954_s23 }
  0xd0   : > { %v3727_v45 = vsel %vm1279_vm4, %v1274_v28, %v2355_v62  ;;  %v3730_v59 = vsel %vm1279_vm4, %v1273_v16, %v2354_v61  ;;  %v2350_v31 = vunpack.i.h.bf16 %v2348_v36  ;;  %v2349_v32 = vunpack.i.l.bf16 %v2348_v36 }
  0xd1   : > { %2637 = vrot.lane.b32.xlu0 %v3373_v19, %s2954_s23  ;;  %v2363_v7 = vpop.permute.xlu1 %2362  ;;  %v1276_v61 = vsel %vm1246_vm3, %v3284_v22, %v2280_v18  ;;  %v4616_v22 = vld [vmem:[#allocation11_spill] sm:$0xff] }
  0xd2   : > { %v3741_v6 = vsel %vm1279_vm4, %v1271_v60, %v2349_v32  ;;  %v3744_v43 = vsel %vm1279_vm4, %v1272_v63, %v2350_v31  ;;  %v2365_v11 = vunpack.i.h.bf16 %v2363_v7  ;;  %v2364_v9 = vunpack.i.l.bf16 %v2363_v7 }
  0xd3   : > { %v2358_v25 = vpop.permute.xlu0 %2357  ;;  %2652 = vrot.lane.b32.xlu1 %v3303_v57, %s2949_s7 }
  0xd4   : > { %v3753_v47 = vsel %vm1279_vm4, %v1278_v14, %v2365_v11  ;;  %v3756_v24 = vsel %vm1279_vm4, %v1277_v3, %v2364_v9  ;;  %v2360_v54 = vunpack.i.h.bf16 %v2358_v25  ;;  %v2359_v62 = vunpack.i.l.bf16 %v2358_v25  ;;  %v2848_v25 = vld [vmem:[%s3038_s30 + $0xa8] sm:$0xff] }
  0xd5   : > { %2647 = vrot.lane.b32.xlu0 %v4614_v50, %s2949_s7  ;;  %v3764_v26 = vpop.permute.xlu1 %2372 }
  0xd6   : > { %v3767_v57 = vsel %vm1279_vm4, %v1275_v35, %v2359_v62  ;;  %v3770_v28 = vsel %vm1279_vm4, %v1276_v61, %v2360_v54  ;;  %v2849_v54 = vld [vmem:[%s3038_s30 + $0xb0] sm:$0xff] }
  0xd7   : > { %v3772_v16 = vpop.permute.xlu0 %2367  ;;  %2662 = vrot.lane.b32.xlu1 %v4615_v10, %s2949_s7  ;;  %v2696_v62 = vpack.i.bf16 %v2849_v54, %v2848_v25 }
  0xd9   : > { %2657 = vrot.lane.b32.xlu0 %v4616_v22, %s2949_s7  ;;  %v3778_v53 = vpop.permute.xlu1 %2382 }
  0xdb   : > { %v3780_v48 = vpop.permute.xlu0 %2377  ;;  %2672 = vrot.lane.b32.xlu1 %v3433_v38, %s2950_s8 }
  0xdd   : > { %2667 = vrot.lane.b32.xlu0 %v3373_v19, %s2950_s8  ;;  %v2393_v50 = vpop.permute.xlu1 %2392 }
  0xde   : > { %v2395_v36 = vunpack.i.h.bf16 %v2393_v50  ;;  %v2394_v31 = vunpack.i.l.bf16 %v2393_v50 }
  0xdf   : > { %v2388_v32 = vpop.permute.xlu0 %2387  ;;  %2682 = vrot.lane.b32.xlu1 %v3460_v20, %s2950_s8 }
  0xe0   : > { %v3790_v63 = vsel %vm1312_vm5, %v3658_v37, %v2394_v31  ;;  %v3794_v60 = vsel %vm1312_vm5, %v3655_v21, %v2395_v36  ;;  %v2390_v38 = vunpack.i.h.bf16 %v2388_v32  ;;  %v2389_v18 = vunpack.i.l.bf16 %v2388_v32  ;;  %v4628_v32 = vld [vmem:[#allocation10_spill] sm:$0xff] }
  0xe1   : > { %4617 = vst [vmem:[#allocation7_spill] sm:$0xff] %v3790_v63  ;;  %4618 = vst [vmem:[#allocation5_spill] sm:$0xff] %v3794_v60  ;;  %2677 = vrot.lane.b32.xlu0 %v3403_v2, %s2950_s8  ;;  %v2403_v19 = vpop.permute.xlu1 %2402  ;;  %v2330_v63 = vunpack.i.h.bf16 %v3700_v30 }
  0xe2   : > { %v3800_v5 = vsel %vm1312_vm5, %v3669_v15, %v2389_v18  ;;  %v3804_v37 = vsel %vm1312_vm5, %v3672_v4, %v2390_v38  ;;  %v2405_v7 = vunpack.i.h.bf16 %v2403_v19  ;;  %v2404_v11 = vunpack.i.l.bf16 %v2403_v19 }
  0xe3   : > { %4619 = vst [vmem:[#allocation6_spill] sm:$0xff] %v3800_v5  ;;  %4620 = vst [vmem:[#allocation9_spill] sm:$0xff] %v3804_v37  ;;  %v2398_v21 = vpop.permute.xlu0 %2397  ;;  %2692 = vrot.lane.b32.xlu1 %v3515_v40, %s2951_s9 }
  0xe4   : > { %v3810_v9 = vsel %vm1312_vm5, %v3684_v41, %v2404_v11  ;;  %v3814_v14 = vsel %vm1312_vm5, %v3681_v1, %v2405_v7  ;;  %v2400_v15 = vunpack.i.h.bf16 %v2398_v21  ;;  %v2399_v3 = vunpack.i.l.bf16 %v2398_v21  ;;  %v3864_v11 = vld [vmem:[%s3038_s30 + $0x198] sm:$0xff]  ;;  %v241_v21 = vld [vmem:[%s3038_s30 + $0x1a8] sm:$0x3] }
  0xe5   : > { %4621 = vst [vmem:[#allocation8_spill] sm:$0xff] %v3810_v9  ;;  %4622 = vst [vmem:[#allocation20_spill] sm:$0xff] %v3814_v14  ;;  %2687 = vrot.lane.b32.xlu0 %v3482_v0, %s2951_s9  ;;  %v3818_v4 = vpop.permute.xlu1 %2412  ;;  %v2854_v9 = vld [vmem:[%s3038_s30 + $0x8] sm:$0xff] }
  0xe6   : > { %v3824_v40 = vsel %vm1312_vm5, %v3695_v58, %v2399_v3  ;;  %v3828_v41 = vsel %vm1312_vm5, %v3698_v44, %v2400_v15 }
  0xe7   : > { %4623 = vst [vmem:[#allocation11_spill] sm:$0xff] %v3824_v40  ;;  %4624 = vst [vmem:[#allocation22_spill] sm:$0xff] %v3828_v41  ;;  %v3830_v1 = vpop.permute.xlu0 %2407  ;;  %2702 = vrot.lane.b32.xlu1 %v3533_v34, %s2951_s9  ;;  %v4625_v34 = vld [vmem:[#allocation19_spill] sm:$0xff]  ;;  %v2255_v40 = vunpack.i.h.bf16 %v3598_v23 }
  0xe9   : > { %2697 = vrot.lane.b32.xlu0 %v2696_v62, %s2951_s9  ;;  %v3835_v0 = vpop.permute.xlu1 %2422 }
  0xeb   : > { %v3837_v61 = vpop.permute.xlu0 %2417  ;;  %2712 = vrot.lane.b32.xlu1 %v4615_v10, %s2952_s18 }
  0xed   : > { %2707 = vrot.lane.b32.xlu0 %v4616_v22, %s2952_s18  ;;  %v2433_v58 = vpop.permute.xlu1 %2432 }
  0xee   : > { %v2435_v44 = vunpack.i.h.bf16 %v2433_v58  ;;  %v2434_v35 = vunpack.i.l.bf16 %v2433_v58 }
  0xef   : > { %v2428_v50 = vpop.permute.xlu0 %2427  ;;  %2722 = vrot.lane.b32.xlu1 %v4625_v34, %s2952_s18 }
  0xf0   : > { %v3847_v36 = vsel %vm1312_vm5, %v3730_v59, %v2434_v35  ;;  %v3851_v10 = vsel %vm1312_vm5, %v3727_v45, %v2435_v44  ;;  %v2430_v31 = vunpack.i.h.bf16 %v2428_v50  ;;  %v2429_v22 = vunpack.i.l.bf16 %v2428_v50  ;;  %v3867_v45 = vld [vmem:[%s3038_s30 + $0x1a0] sm:$0xff] }
  0xf1   : > { %4626 = vst [vmem:[#allocation19_spill] sm:$0xff] %v3847_v36  ;;  %4627 = vst [vmem:[#allocation23_spill] sm:$0xff] %v3851_v10  ;;  %2717 = vrot.lane.b32.xlu0 %v4628_v32, %s2952_s18  ;;  %v2443_v38 = vpop.permute.xlu1 %2442  ;;  %v469_v3 = vrot.slane %v3867_v45, 1  ;;  %v2215_v50 = vunpack.i.h.bf16 %v3576_v17  ;;  %v2375_v36 = vunpack.i.h.bf16 %v3764_v26 }
  0xf2   : > { %v3857_v18 = vsel %vm1312_vm5, %v3741_v6, %v2429_v22  ;;  %v3861_v19 = vsel %vm1312_vm5, %v3744_v43, %v2430_v31  ;;  %v2445_v59 = vunpack.i.h.bf16 %v2443_v38  ;;  %v2444_v7 = vunpack.i.l.bf16 %v2443_v38 }
  0xf3   : > { %4629 = vst [vmem:[#allocation10_spill] sm:$0xff] %v3861_v19  ;;  %v2438_v15 = vpop.permute.xlu0 %2437  ;;  %2732 = vrot.lane.b32.xlu1 %v3460_v20, %s2954_s23  ;;  %v468_v6 = vrot.slane %v3864_v11, 1  ;;  %v471_v20 = vrot.slane %v241_v21, 1  ;;  %v474_v38 = vrot.slane %v3867_v45, 2  ;;  %v2370_v19 = vunpack.i.h.bf16 %v3772_v16 }
  0xf4   : > { %v3876_v25 = vsel %vm1312_vm5, %v3756_v24, %v2444_v7  ;;  %v3880_v43 = vsel %vm1312_vm5, %v3753_v47, %v2445_v59  ;;  %v2440_v54 = vunpack.i.h.bf16 %v2438_v15  ;;  %v2439_v62 = vunpack.i.l.bf16 %v2438_v15 }
  0xf5   : > { %4630 = vst [vmem:[#allocation24_spill] sm:$0xff] %v3876_v25  ;;  %4631 = vst [vmem:[#allocation25_spill] sm:$0xff] %v3880_v43  ;;  %2727 = vrot.lane.b32.xlu0 %v3403_v2, %s2954_s23  ;;  %v3884_v58 = vpop.permute.xlu1 %2452  ;;  %v3899_v2 = vsel %vm290_vm0, %v468_v6, %v469_v3  ;;  %v2210_v47 = vunpack.i.h.bf16 %v3567_v56  ;;  %v3909_v22 = vsel %vm290_vm0, %v469_v3, %v471_v20  ;;  %v473_v59 = vrot.slane %v3864_v11, 2  ;;  %v3919_v6 = vld [vmem:[%s3038_s30 + $0xc0] sm:$0xff]  ;;  %v3929_v20 = vld [vmem:[%s3038_s30 + $0xd8] sm:$0xff] }
  0xf6   : > { %v3888_v44 = vsel %vm1312_vm5, %v3767_v57, %v2439_v62  ;;  %v3892_v24 = vsel %vm1312_vm5, %v3770_v28, %v2440_v54  ;;  %v2209_v57 = vunpack.i.l.bf16 %v3567_v56  ;;  %v4634_v28 = vld [vmem:[#allocation21_spill] sm:$0xff]  ;;  %v476_v7 = vrot.slane %v241_v21, 2  ;;  %v3922_v54 = vld [vmem:[%s3038_s30 + $0xc8] sm:$0xff] }
  0xf7   : > { %4632 = vst [vmem:[#allocation26_spill] sm:$0xff] %v3888_v44  ;;  %4633 = vst [vmem:[#allocation27_spill] sm:$0xff] %v3892_v24  ;;  %v3894_v35 = vpop.permute.xlu0 %2447  ;;  %2742 = vrot.lane.b32.xlu1 %v3456_v55, %s2954_s23  ;;  %v2214_v56 = vunpack.i.l.bf16 %v3576_v17  ;;  %v3932_v21 = vld [vmem:[%s3038_s30 + $0xe0] sm:$0xff]  ;;  %v1248_v14 = vsel %vm1246_vm3, %v2854_v9, %v2210_v47  ;;  %v2254_v17 = vunpack.i.l.bf16 %v3598_v23  ;;  %v2857_v47 = vld [vmem:[%s3038_s30 + $0x18] sm:$0xff]  ;;  %v2295_v23 = vunpack.i.h.bf16 %v3630_v51 }
  0xf8   : > { %v2855_v43 = vld [vmem:[%s3038_s30] sm:$0xff]  ;;  %v3954_v9 = vsel %vm371_vm1, %v474_v38, %v476_v7  ;;  %v2335_v7 = vunpack.i.h.bf16 %v3692_v42  ;;  %v2369_v44 = vunpack.i.l.bf16 %v3772_v16  ;;  %v2409_v16 = vunpack.i.l.bf16 %v3830_v1 }
  0xf9   : > { %2737 = vrot.lane.b32.xlu0 %v4634_v28, %s2954_s23  ;;  %v3906_v31 = vpop.permute.xlu1 %2462  ;;  %v1247_v3 = vsel %vm1246_vm3, %v2855_v43, %v2209_v57  ;;  %v2856_v25 = vld [vmem:[%s3038_s30 + $0x20] sm:$0xff]  ;;  %v1249_v43 = vsel %vm1246_vm3, %v2857_v47, %v2214_v56  ;;  %v2249_v57 = vunpack.i.l.bf16 %v3600_v13  ;;  %v2334_v56 = vunpack.i.l.bf16 %v3692_v42 }
  0xfa   : > { %v1250_v62 = vsel %vm1246_vm3, %v2856_v25, %v2215_v50  ;;  %v2250_v25 = vunpack.i.h.bf16 %v3600_v13  ;;  %v2294_v50 = vunpack.i.l.bf16 %v3630_v51  ;;  %v2329_v47 = vunpack.i.l.bf16 %v3700_v30  ;;  %v4635_v13 = vld [vmem:[#allocation18_spill] sm:$0xff] }
  0xfb   : > { %v3914_v15 = vpop.permute.xlu0 %2457  ;;  %2752 = vrot.lane.b32.xlu1 %v4625_v34, %s2949_s7  ;;  %v3951_v34 = vsel %vm371_vm1, %v473_v59, %v474_v38  ;;  %v2290_v59 = vunpack.i.h.bf16 %v3632_v46  ;;  %v2289_v38 = vunpack.i.l.bf16 %v3632_v46  ;;  %v1266_v51 = vsel %vm1246_vm3, %v3932_v21, %v2255_v40 }
  0xfc   : > { %v1265_v46 = vsel %vm1246_vm3, %v3929_v20, %v2254_v17  ;;  %v2374_v42 = vunpack.i.l.bf16 %v3764_v26  ;;  %v1264_v60 = vsel %vm1246_vm3, %v3922_v54, %v2250_v25  ;;  %v1263_v10 = vsel %vm1246_vm3, %v3919_v6, %v2249_v57 }
  0xfd   : > { %2747 = vrot.lane.b32.xlu0 %v4628_v32, %s2949_s7  ;;  %v3946_v41 = vpop.permute.xlu1 %2472  ;;  %v1282_v30 = vsel %vm1279_vm4, %v1249_v43, %v2294_v50  ;;  %v1283_v40 = vsel %vm1279_vm4, %v1250_v62, %v2295_v23  ;;  %v1280_v17 = vsel %vm1279_vm4, %v1247_v3, %v2289_v38  ;;  %v1281_v25 = vsel %vm1279_vm4, %v1248_v14, %v2290_v59 }
  0xfe   : > { %v1299_v57 = vsel %vm1279_vm4, %v1266_v51, %v2335_v7  ;;  %v1298_v26 = vsel %vm1279_vm4, %v1265_v46, %v2334_v56  ;;  %v1296_v5 = vsel %vm1279_vm4, %v1263_v10, %v2329_v47  ;;  %v1297_v43 = vsel %vm1279_vm4, %v1264_v60, %v2330_v63 }
  0xff   : > { %v3960_v32 = vpop.permute.xlu0 %2467  ;;  %2762 = vrot.lane.b32.xlu1 %v3539_v52, %s2949_s7  ;;  %v1315_v62 = vsel %vm1312_vm5, %v1282_v30, %v2374_v42  ;;  %v2415_v3 = vunpack.i.h.bf16 %v3818_v4  ;;  %v2414_v14 = vunpack.i.l.bf16 %v3818_v4  ;;  %v1316_v23 = vsel %vm1312_vm5, %v1283_v40, %v2375_v36 }
 0x100   : > { %v1313_v50 = vsel %vm1312_vm5, %v1280_v17, %v2369_v44  ;;  %v2410_v10 = vunpack.i.h.bf16 %v3830_v1  ;;  %v2455_v63 = vunpack.i.h.bf16 %v3884_v58  ;;  %v2454_v60 = vunpack.i.l.bf16 %v3884_v58 }
 0x101   : > { %2757 = vrot.lane.b32.xlu0 %v4635_v13, %s2949_s7  ;;  %v3973_v24 = vpop.permute.xlu1 %2482  ;;  %v2449_v4 = vunpack.i.l.bf16 %v3894_v35  ;;  %v1314_v36 = vsel %vm1312_vm5, %v1281_v25, %v2370_v19  ;;  %v2465_v44 = vunpack.i.h.bf16 %v3906_v31  ;;  %v2464_v38 = vunpack.i.l.bf16 %v3906_v31  ;;  %s4477_s7 = scalar_lea.hbm %s4540_s3, %s2080_s4 }
 0x102   : > { %v2459_v1 = vunpack.i.l.bf16 %v3914_v15  ;;  %v1331_v56 = vsel %vm1312_vm5, %v1298_v26, %v2414_v14  ;;  %v1332_v58 = vsel %vm1312_vm5, %v1299_v57, %v2415_v3  ;;  %v2460_v47 = vunpack.i.h.bf16 %v3914_v15 }
 0x103   : > { %v3989_v37 = vpop.permute.xlu0 %2477  ;;  %2772 = vrot.lane.b32.xlu1 %v3456_v55, %s2950_s8  ;;  %v1329_v19 = vsel %vm1312_vm5, %v1296_v5, %v2409_v16  ;;  %v1330_v51 = vsel %vm1312_vm5, %v1297_v43, %v2410_v10  ;;  %v2475_v31 = vunpack.i.h.bf16 %v3946_v41  ;;  %v2469_v46 = vunpack.i.l.bf16 %v3960_v32 }
 0x104   : > { %v1362_v30 = vsel %vm1345_vm6, %v1329_v19, %v2454_v60  ;;  %v1363_v40 = vsel %vm1345_vm6, %v1330_v51, %v2455_v63  ;;  %v1346_v15 = vsel %vm1345_vm6, %v1313_v50, %v2449_v4  ;;  %v1364_v5 = vsel %vm1345_vm6, %v1331_v56, %v2464_v38 }
 0x105   : > { %2767 = vrot.lane.b32.xlu0 %v4634_v28, %s2950_s8  ;;  %v4003_v55 = vpop.permute.xlu1 %2492  ;;  %v2450_v28 = vunpack.i.h.bf16 %v3894_v35  ;;  %v2474_v35 = vunpack.i.l.bf16 %v3946_v41  ;;  %v1365_v25 = vsel %vm1345_vm6, %v1332_v58, %v2465_v44  ;;  %v1348_v41 = vsel %vm1345_vm6, %v1315_v62, %v2459_v1 }
 0x106   : > { %v2470_v57 = vunpack.i.h.bf16 %v3960_v32  ;;  %v1349_v43 = vsel %vm1345_vm6, %v1316_v23, %v2460_v47  ;;  %v2485_v14 = vunpack.i.h.bf16 %v3973_v24  ;;  %v2484_v50 = vunpack.i.l.bf16 %v3973_v24 }
 0x107   : > { %v4013_v59 = vpop.permute.xlu0 %2487  ;;  %2782 = vrot.lane.b32.xlu1 %v3551_v12, %s2950_s8  ;;  %v1347_v17 = vsel %vm1345_vm6, %v1314_v36, %v2450_v28  ;;  %v1395_v3 = vsel %vm1378_vm7, %v1362_v30, %v2474_v35  ;;  %v1396_v10 = vsel %vm1378_vm7, %v1363_v40, %v2475_v31  ;;  %v1379_v62 = vsel %vm1378_vm7, %v1346_v15, %v2469_v46 }
 0x108   : > { %v2480_v32 = vunpack.i.h.bf16 %v3989_v37  ;;  %v2479_v16 = vunpack.i.l.bf16 %v3989_v37  ;;  %v2495_v23 = vunpack.i.h.bf16 %v4003_v55  ;;  %v2494_v63 = vunpack.i.l.bf16 %v4003_v55 }
 0x109   : > { %2777 = vrot.lane.b32.xlu0 %v3426_v8, %s2950_s8  ;;  %v2503_v7 = vpop.permute.xlu1 %2502  ;;  %v2490_v24 = vunpack.i.h.bf16 %v4013_v59  ;;  %v2489_v60 = vunpack.i.l.bf16 %v4013_v59  ;;  %v1380_v28 = vsel %vm1378_vm7, %v1347_v17, %v2470_v57  ;;  %v4638_v44 = vpack.i.bf16 %v3932_v21, %v3929_v20  ;;  %s4491_s8 = scalar_lea.sflag [#allocation3], %s175_s28 }
 0x10a   : > { %v2505_v4 = vunpack.i.h.bf16 %v2503_v7  ;;  %v2504_v36 = vunpack.i.l.bf16 %v2503_v7  ;;  %v1398_v55 = vsel %vm1378_vm7, %v1365_v25, %v2485_v14  ;;  %v1381_v59 = vsel %vm1378_vm7, %v1348_v41, %v2479_v16 }
 0x10b   : > { %v2498_v42 = vpop.permute.xlu0 %2497  ;;  %2792 = vrot.lane.b32.xlu1 %v3526_v29, %s2951_s9  ;;  %v4636_v29 = vpack.i.bf16 %v3922_v54, %v3919_v6  ;;  %v4637_v54 = vpack.i.bf16 %v3867_v45, %v3864_v11  ;;  %v1397_v45 = vsel %vm1378_vm7, %v1364_v5, %v2484_v50  ;;  %v1382_v56 = vsel %vm1378_vm7, %v1349_v43, %v2480_v32 }
 0x10c   : > { %v2499_v37 = vunpack.i.l.bf16 %v2498_v42  ;;  %v2500_v38 = vunpack.i.h.bf16 %v2498_v42  ;;  %v1428_v20 = vsel %vm1411_vm8, %v1395_v3, %v2494_v63  ;;  %v1429_v21 = vsel %vm1411_vm8, %v1396_v10, %v2495_v23 }
 0x10d   : > { %2787 = vrot.lane.b32.xlu0 %v4636_v29, %s2951_s9  ;;  %v2513_v26 = vpop.permute.xlu1 %2512  ;;  %v1412_v35 = vsel %vm1411_vm8, %v1379_v62, %v2489_v60  ;;  %v1413_v19 = vsel %vm1411_vm8, %v1380_v28, %v2490_v24  ;;  %v1430_v51 = vsel %vm1411_vm8, %v1397_v45, %v2504_v36  ;;  %v1431_v31 = vsel %vm1411_vm8, %v1398_v55, %v2505_v4 }
 0x10e   : > { %v2514_v1 = vunpack.i.l.bf16 %v2513_v26  ;;  %v2515_v58 = vunpack.i.h.bf16 %v2513_v26  ;;  %v1414_v46 = vsel %vm1411_vm8, %v1381_v59, %v2499_v37  ;;  %v4639_v57 = vpack.i.bf16 %v3909_v22, %v3899_v2 }
 0x10f   : > { %v2508_v6 = vpop.permute.xlu0 %2507  ;;  %2802 = vrot.lane.b32.xlu1 %v4637_v54, %s2951_s9  ;;  %v4640_v59 = vpack.i.bf16 %v3954_v9, %v3951_v34 }
 0x110   : > { %v2509_v47 = vunpack.i.l.bf16 %v2508_v6  ;;  %v2510_v42 = vunpack.i.h.bf16 %v2508_v6  ;;  %v1461_v17 = vsel %vm1444_vm9, %v1428_v20, %v2514_v1  ;;  %v1462_v26 = vsel %vm1444_vm9, %v1429_v21, %v2515_v58  ;;  %v4642_v20 = vld [vmem:[#allocation13_spill] sm:$0xff] }
 0x111   : > { %2797 = vrot.lane.b32.xlu0 %v4638_v44, %s2951_s9  ;;  %v2523_v11 = vpop.permute.xlu1 %2522  ;;  %v2225_v21 = vunpack.i.h.bf16 %v4642_v20  ;;  %v2224_v34 = vunpack.i.l.bf16 %v4642_v20  ;;  %v2420_v20 = vunpack.i.h.bf16 %v3837_v61 }
 0x112   : > { %v2525_v5 = vunpack.i.h.bf16 %v2523_v11  ;;  %v2524_v25 = vunpack.i.l.bf16 %v2523_v11  ;;  %v1445_v29 = vsel %vm1444_vm9, %v1412_v35, %v2509_v47  ;;  %v1446_v32 = vsel %vm1444_vm9, %v1413_v19, %v2510_v42  ;;  %v4643_v35 = vld [vmem:[#allocation15_spill] sm:$0xff] }
 0x113   : > { %v2518_v7 = vpop.permute.xlu0 %2517  ;;  %2812 = vrot.lane.b32.xlu1 %v3539_v52, %s2952_s18  ;;  %v1415_v52 = vsel %vm1411_vm8, %v1382_v56, %v2500_v38  ;;  %v4641_v56 = vld [vmem:[#allocation12_spill] sm:$0xff]  ;;  %v2264_v19 = vunpack.i.l.bf16 %v4643_v35 }
 0x114   : > { %v2520_v50 = vunpack.i.h.bf16 %v2518_v7  ;;  %v2519_v10 = vunpack.i.l.bf16 %v2518_v7  ;;  %v1463_v23 = vsel %vm1444_vm9, %v1430_v51, %v2524_v25  ;;  %v1464_v63 = vsel %vm1444_vm9, %v1431_v31, %v2525_v5  ;;  %v2858_v51 = vld [vmem:[%s3038_s30 + $0x38] sm:$0xff] }
 0x115   : > { %2807 = vrot.lane.b32.xlu0 %v4635_v13, %s2952_s18  ;;  %v2533_v30 = vpop.permute.xlu1 %2532  ;;  %v2220_v58 = vunpack.i.h.bf16 %v4641_v56  ;;  %v2219_v47 = vunpack.i.l.bf16 %v4641_v56  ;;  %v2424_v56 = vunpack.i.l.bf16 %v3835_v0 }
 0x116   : > { %v2535_v40 = vunpack.i.h.bf16 %v2533_v30  ;;  %v2534_v15 = vunpack.i.l.bf16 %v2533_v30  ;;  %v1447_v37 = vsel %vm1444_vm9, %v1414_v46, %v2519_v10  ;;  %v1448_v44 = vsel %vm1444_vm9, %v1415_v52, %v2520_v50  ;;  %v2859_v46 = vld [vmem:[%s3038_s30 + $0x30] sm:$0xff]  ;;  %v4644_v30 = vld [vmem:[#allocation16_spill] sm:$0xff] }
 0x117   : > { %v2528_v41 = vpop.permute.xlu0 %2527  ;;  %2822 = vrot.lane.b32.xlu1 %v4639_v57, %s2952_s18  ;;  %v1252_v31 = vsel %vm1246_vm3, %v2858_v51, %v2220_v58  ;;  %v1251_v42 = vsel %vm1246_vm3, %v2859_v46, %v2219_v47  ;;  %v2260_v52 = vunpack.i.h.bf16 %v4644_v30  ;;  %v2344_v50 = vunpack.i.l.bf16 %v3706_v49 }
 0x118   : > { %v2530_v13 = vunpack.i.h.bf16 %v2528_v41  ;;  %v2529_v43 = vunpack.i.l.bf16 %v2528_v41  ;;  %v1494_v3 = vsel %vm1477_vm10, %v1461_v17, %v2534_v15  ;;  %v1495_v14 = vsel %vm1477_vm10, %v1462_v26, %v2535_v40  ;;  %v4645_v17 = vld [vmem:[#allocation17_spill] sm:$0xff]  ;;  %v4646_v41 = vld [vmem:[#allocation14_spill] sm:$0xff]  ;;  %v2860_v26 = vld [vmem:[%s3038_s30 + $0x50] sm:$0xff] }
 0x119   : > { %2817 = vrot.lane.b32.xlu0 %v4603_v33, %s2952_s18  ;;  %v2543_v62 = vpop.permute.xlu1 %2542  ;;  %v1518_v2 = vpack.c.bf16 %v1495_v14, %v1494_v3  ;;  %v2259_v40 = vunpack.i.l.bf16 %v4644_v30  ;;  %v2305_v5 = vunpack.i.h.bf16 %v4645_v17  ;;  %v2304_v25 = vunpack.i.l.bf16 %v4645_v17  ;;  %s2872_s18 = scalar_lea.vmem %s2871_s11, 8192 }
 0x11a   : > { %v2545_v22 = vunpack.i.h.bf16 %v2543_v62  ;;  %v2544_v16 = vunpack.i.l.bf16 %v2543_v62  ;;  %v1478_v6 = vsel %vm1477_vm10, %v1445_v29, %v2529_v43  ;;  %v1479_v54 = vsel %vm1477_vm10, %v1446_v32, %v2530_v13  ;;  %v2861_v43 = vld [vmem:[%s3038_s30 + $0x48] sm:$0xff]  ;;  %v2862_v62 = vld [vmem:[%s3038_s30 + $0x110] sm:$0xff] }
 0x11b   : > { %v2538_v24 = vpop.permute.xlu0 %2537  ;;  %2832 = vrot.lane.b32.xlu1 %v3551_v12, %s2954_s23  ;;  %v1510_v60 = vpack.c.bf16 %v1479_v54, %v1478_v6  ;;  %2119 = vmatprep.mubr.msk.bf16.mxu1 %vm1548_vm11, %v1518_v2  ;;  %v2300_v57 = vunpack.i.h.bf16 %v4646_v41  ;;  %v2299_v29 = vunpack.i.l.bf16 %v4646_v41  ;;  %v1254_v13 = vsel %vm1246_vm3, %v2860_v26, %v2225_v21  ;;  %v2863_v2 = vld [vmem:[%s3038_s30 + $0x108] sm:$0xff]  ;;  %v2864_v54 = vld [vmem:[%s3038_s30 + $0xf8] sm:$0xff] }
 0x11c   : > { %v1496_v33 = vsel %vm1477_vm10, %v1463_v23, %v2544_v16  ;;  %v1497_v28 = vsel %vm1477_vm10, %v1464_v63, %v2545_v22  ;;  %v2540_v4 = vunpack.i.h.bf16 %v2538_v24  ;;  %v2539_v36 = vunpack.i.l.bf16 %v2538_v24  ;;  %v2865_v63 = vld [vmem:[%s3038_s30 + $0xf0] sm:$0xff]  ;;  %s4390_s30 = scalar_lea.vmem [#allocation2], %s2054_s29 }
 0x11d   : > { %v1519_v11 = vpack.c.bf16 %v1497_v28, %v1496_v33  ;;  %2827 = vrot.lane.b32.xlu0 %v3426_v8, %s2954_s23  ;;  %2103 = vmatprep.mubr.msk.bf16.mxu0 %vm1548_vm11, %v1510_v60  ;;  %v4112_v12 = vpop.permute.xlu1 %2552  ;;  %v1253_v3 = vsel %vm1246_vm3, %v2861_v43, %v2224_v34  ;;  %v2345_v14 = vunpack.i.h.bf16 %v3706_v49  ;;  %v1269_v22 = vsel %vm1246_vm3, %v2863_v2, %v2264_v19  ;;  %s1974_s5 = sshll.u32 %s4390_s30, 4  ;;  %s4479_s5 = int_to_ptr.vmem [resolvable:$true] %s1974_s5 }
 0x11e   : > { %v1480_v45 = vsel %vm1477_vm10, %v1447_v37, %v2539_v36  ;;  %v1481_v55 = vsel %vm1477_vm10, %v1448_v44, %v2540_v4  ;;  %v2340_v16 = vunpack.i.h.bf16 %v3710_v27  ;;  %v2339_v6 = vunpack.i.l.bf16 %v3710_v27  ;;  %s2866_s9 = scalar_lea.vmem %s4479_s5, 4096  ;;  %p2873_p1 = scmp.lt.s32.totalorder %s4479_s5, %s2871_s11 }
 0x11f   : > { %v1511_v38 = vpack.c.bf16 %v1481_v55, %v1480_v45  ;;  %v4116_v1 = vpop.permute.xlu0 %2547  ;;  %2842 = vrot.lane.b32.xlu1 %v4640_v59, %s2954_s23  ;;  %2120 = vmatmul.mubr.msk.bf16.vlgmr.msra.gmra.mrb[0].mxu1 %vm1548_vm11, %v1519_v11  ;;  %v1268_v23 = vsel %vm1246_vm3, %v2864_v54, %v2260_v52  ;;  %v1267_v24 = vsel %vm1246_vm3, %v2865_v63, %v2259_v40  ;;  %v2385_v49 = vunpack.i.h.bf16 %v3778_v53  ;;  %p2867_p12 = scmp.ne.s32.totalorder %s4479_s5, %s2866_s9  ;;  %p2874_p2 = scmp.lt.s32.totalorder %s2872_s18, %s2866_s9 }
 0x120   : > { %v2384_v60 = vunpack.i.l.bf16 %v3778_v53  ;;  %v1287_v28 = vsel %vm1279_vm4, %v1254_v13, %v2305_v5  ;;  %v1286_v4 = vsel %vm1279_vm4, %v1253_v3, %v2304_v25  ;;  %v1285_v36 = vsel %vm1279_vm4, %v1252_v31, %v2300_v57 }
 0x121   : > { %2837 = vrot.lane.b32.xlu0 %v3407_v39, %s2954_s23  ;;  %2104 = vmatmul.mubr.msk.bf16.vlgmr.msra.gmra.mrb[0].mxu0 %vm1548_vm11, %v1511_v38  ;;  %v4126_v8 = vpop.permute.xlu1 %2562  ;;  %v2265_v39 = vunpack.i.h.bf16 %v4643_v35  ;;  %v1284_v27 = vsel %vm1279_vm4, %v1251_v42, %v2299_v29  ;;  %v1302_v44 = vsel %vm1279_vm4, %v1269_v22, %v2344_v50  ;;  %v2380_v11 = vunpack.i.h.bf16 %v3780_v48  ;;  %p2868_p13 = pnand %p2867_p12, %p3018_p4  ;;  %p2875_p3 = por %p2874_p2, %p2873_p1 }
 0x122   : > { %v2379_v45 = vunpack.i.l.bf16 %v3780_v48  ;;  %v1300_v53 = vsel %vm1279_vm4, %v1267_v24, %v2339_v6  ;;  %v1301_v38 = vsel %vm1279_vm4, %v1268_v23, %v2340_v16  ;;  %v2425_v59 = vunpack.i.h.bf16 %v3835_v0 }
 0x123   : > { %v4130_v7 = vpop.permute.xlu0 %2557  ;;  %v1270_v32 = vsel %vm1246_vm3, %v2862_v62, %v2265_v39  ;;  %v1319_v58 = vsel %vm1312_vm5, %v1286_v4, %v2384_v60  ;;  %v1320_v47 = vsel %vm1312_vm5, %v1287_v28, %v2385_v49  ;;  %v2419_v21 = vunpack.i.l.bf16 %v3837_v61  ;;  %p2869_p0 = pneg %p2868_p13 }
 0x124   : > { %v1303_v37 = vsel %vm1279_vm4, %v1270_v32, %v2345_v14  ;;  %v2555_v48 = vunpack.i.h.bf16 %v4112_v12  ;;  %v2554_v35 = vunpack.i.l.bf16 %v4112_v12  ;;  %v2550_v39 = vunpack.i.h.bf16 %v4116_v1 }
 0x125   : > { %v4134_v9 = vpop.permute.xlu1 %2572  ;;  %v2549_v19 = vunpack.i.l.bf16 %v4116_v1  ;;  %v1317_v51 = vsel %vm1312_vm5, %v1284_v27, %v2379_v45  ;;  %v1318_v0 = vsel %vm1312_vm5, %v1285_v36, %v2380_v11  ;;  %v2565_v31 = vunpack.i.h.bf16 %v4126_v8  ;;  %p2876_p5 = pnand %p2875_p3, %p2869_p0 }
 0x126   : > { %v2564_v46 = vunpack.i.l.bf16 %v4126_v8  ;;  %v1335_v61 = vsel %vm1312_vm5, %v1302_v44, %v2424_v56  ;;  %v1336_v30 = vsel %vm1312_vm5, %v1303_v37, %v2425_v59  ;;  %v2560_v52 = vunpack.i.h.bf16 %v4130_v7 }
 0x127   : > { %v4144_v15 = vpop.permute.xlu0 %2567  ;;  %v2559_v12 = vunpack.i.l.bf16 %v4130_v7  ;;  %v1333_v40 = vsel %vm1312_vm5, %v1300_v53, %v2419_v21  ;;  %v1334_v1 = vsel %vm1312_vm5, %v1301_v38, %v2420_v20  ;;  %v2575_v17 = vunpack.i.h.bf16 %v4134_v9 }
 0x128   : > { %v2574_v5 = vunpack.i.l.bf16 %v4134_v9  ;;  %v1366_v8 = vsel %vm1345_vm6, %v1333_v40, %v2554_v35  ;;  %v1367_v41 = vsel %vm1345_vm6, %v1334_v1, %v2555_v48  ;;  %v1350_v57 = vsel %vm1345_vm6, %v1317_v51, %v2549_v19 }
 0x129   : > { %v4156_v10 = vpop.permute.xlu1 %2582  ;;  %v1351_v29 = vsel %vm1345_vm6, %v1318_v0, %v2550_v39  ;;  %v1368_v7 = vsel %vm1345_vm6, %v1335_v61, %v2564_v46  ;;  %v1369_v26 = vsel %vm1345_vm6, %v1336_v30, %v2565_v31  ;;  %v2570_v13 = vunpack.i.h.bf16 %v4144_v15 }
 0x12a   : > { %v2569_v43 = vunpack.i.l.bf16 %v4144_v15  ;;  %v1353_v9 = vsel %vm1345_vm6, %v1320_v47, %v2560_v52  ;;  %v1352_v14 = vsel %vm1345_vm6, %v1319_v58, %v2559_v12  ;;  %v2585_v50 = vunpack.i.h.bf16 %v4156_v10 }
 0x12b   : > { %v4170_v33 = vpop.permute.xlu0 %2577  ;;  %v2584_v62 = vunpack.i.l.bf16 %v4156_v10  ;;  %v1399_v32 = vsel %vm1378_vm7, %v1366_v8, %v2574_v5  ;;  %v1400_v2 = vsel %vm1378_vm7, %v1367_v41, %v2575_v17  ;;  %v1384_v49 = vsel %vm1378_vm7, %v1351_v29, %v2570_v13 }
 0x12c   : > { %v2580_v22 = vunpack.i.h.bf16 %v4170_v33  ;;  %v2579_v16 = vunpack.i.l.bf16 %v4170_v33  ;;  %v1383_v24 = vsel %vm1378_vm7, %v1350_v57, %v2569_v43  ;;  %v1402_v36 = vsel %vm1378_vm7, %v1369_v26, %v2585_v50 }
 0x12d   : > { %v4180_v55 = vpop.permute.xlu1 %2592  ;;  %v1401_v4 = vsel %vm1378_vm7, %v1368_v7, %v2584_v62 }
 0x12e   : > { %v2595_v15 = vunpack.i.h.bf16 %v4180_v55  ;;  %v2594_v54 = vunpack.i.l.bf16 %v4180_v55  ;;  %v1385_v37 = vsel %vm1378_vm7, %v1352_v14, %v2579_v16  ;;  %v1386_v44 = vsel %vm1378_vm7, %v1353_v9, %v2580_v22 }
 0x12f   : > { %v2588_v34 = vpop.permute.xlu0 %2587 }
 0x130   : > { %v2590_v23 = vunpack.i.h.bf16 %v2588_v34  ;;  %v2589_v63 = vunpack.i.l.bf16 %v2588_v34  ;;  %v1432_v53 = vsel %vm1411_vm8, %v1399_v32, %v2594_v54  ;;  %v1433_v38 = vsel %vm1411_vm8, %v1400_v2, %v2595_v15 }
 0x131   : > { %v2603_v42 = vpop.permute.xlu1 %2602 }
 0x132   : > { %v2605_v10 = vunpack.i.h.bf16 %v2603_v42  ;;  %v2604_v60 = vunpack.i.l.bf16 %v2603_v42  ;;  %v1416_v59 = vsel %vm1411_vm8, %v1383_v24, %v2589_v63  ;;  %v1417_v56 = vsel %vm1411_vm8, %v1384_v49, %v2590_v23 }
 0x133   : > { %v4206_v25 = vpop.permute.xlu0 %2597 }
 0x134   : > { %v2599_v33 = vunpack.i.l.bf16 %v4206_v25  ;;  %v1434_v58 = vsel %vm1411_vm8, %v1401_v4, %v2604_v60  ;;  %v1435_v47 = vsel %vm1411_vm8, %v1402_v36, %v2605_v10  ;;  %v2600_v20 = vunpack.i.h.bf16 %v4206_v25 }
 0x135   : > { %v2613_v3 = vpop.permute.xlu1 %2612 }
 0x136   : > { %v2614_v27 = vunpack.i.l.bf16 %v2613_v3  ;;  %v2615_v11 = vunpack.i.h.bf16 %v2613_v3  ;;  %v1418_v48 = vsel %vm1411_vm8, %v1385_v37, %v2599_v33  ;;  %v1419_v7 = vsel %vm1411_vm8, %v1386_v44, %v2600_v20  ;;  %v4647_v20 = vld [vmem:[#allocation10_spill] sm:$0xff] }
 0x137   : > { %v2608_v6 = vpop.permute.xlu0 %2607 }
 0x138   : > { %v2609_v45 = vunpack.i.l.bf16 %v2608_v6  ;;  %v2610_v21 = vunpack.i.h.bf16 %v2608_v6  ;;  %v1465_v35 = vsel %vm1444_vm9, %v1432_v53, %v2614_v27  ;;  %v1466_v51 = vsel %vm1444_vm9, %v1433_v38, %v2615_v11 }
 0x139   : > { %v2623_v28 = vpop.permute.xlu1 %2622 }
 0x13a   : > { %v1449_v0 = vsel %vm1444_vm9, %v1416_v59, %v2609_v45  ;;  %v2625_v31 = vunpack.i.h.bf16 %v2623_v28  ;;  %v2624_v46 = vunpack.i.l.bf16 %v2623_v28  ;;  %v1450_v40 = vsel %vm1444_vm9, %v1417_v56, %v2610_v21 }
 0x13b   : > { %v2618_v55 = vpop.permute.xlu0 %2617 }
 0x13c   : > { %v2620_v1 = vunpack.i.h.bf16 %v2618_v55  ;;  %v2619_v17 = vunpack.i.l.bf16 %v2618_v55  ;;  %v1467_v26 = vsel %vm1444_vm9, %v1434_v58, %v2624_v46  ;;  %v1468_v13 = vsel %vm1444_vm9, %v1435_v47, %v2625_v31 }
 0x13d   : > { %v2633_v34 = vpop.permute.xlu1 %2632 }
 0x13e   : > { %v2635_v39 = vunpack.i.h.bf16 %v2633_v34  ;;  %v2634_v19 = vunpack.i.l.bf16 %v2633_v34  ;;  %v1451_v32 = vsel %vm1444_vm9, %v1418_v48, %v2619_v17  ;;  %v1452_v2 = vsel %vm1444_vm9, %v1419_v7, %v2620_v1  ;;  %v4648_v34 = vld [vmem:[#allocation6_spill] sm:$0xff] }
 0x13f   : > { %v2628_v42 = vpop.permute.xlu0 %2627 }
 0x140   : > { %v1498_v61 = vsel %vm1477_vm10, %v1465_v35, %v2634_v19  ;;  %v1499_v30 = vsel %vm1477_vm10, %v1466_v51, %v2635_v39  ;;  %v2630_v52 = vunpack.i.h.bf16 %v2628_v42  ;;  %v2629_v12 = vunpack.i.l.bf16 %v2628_v42  ;;  %v4649_v35 = vld [vmem:[#allocation9_spill] sm:$0xff]  ;;  %v4650_v19 = vld [vmem:[#allocation19_spill] sm:$0xff] }
 0x141   : > { %v1520_v5 = vpack.c.bf16 %v1499_v30, %v1498_v61  ;;  %v2643_v25 = vpop.permute.xlu1 %2642  ;;  %v4652_v30 = vld [vmem:[#allocation5_spill] sm:$0xff] }
 0x142   : > { %v1482_v8 = vsel %vm1477_vm10, %v1449_v0, %v2629_v12  ;;  %v1483_v41 = vsel %vm1477_vm10, %v1450_v40, %v2630_v52  ;;  %v2645_v57 = vunpack.i.h.bf16 %v2643_v25  ;;  %v2644_v29 = vunpack.i.l.bf16 %v2643_v25  ;;  %v4651_v0 = vld [vmem:[#allocation23_spill] sm:$0xff] }
 0x143   : > { %v1512_v43 = vpack.c.bf16 %v1483_v41, %v1482_v8  ;;  %v2638_v3 = vpop.permute.xlu0 %2637  ;;  %2123 = vmatprep.mubr.msk.bf16.mxu1 %vm1548_vm11, %v1520_v5  ;;  %v4653_v52 = vld [vmem:[#allocation7_spill] sm:$0xff] }
 0x144   : > { %v1500_v9 = vsel %vm1477_vm10, %v1467_v26, %v2644_v29  ;;  %v1501_v14 = vsel %vm1477_vm10, %v1468_v13, %v2645_v57  ;;  %v2640_v50 = vunpack.i.h.bf16 %v2638_v3  ;;  %v2639_v62 = vunpack.i.l.bf16 %v2638_v3 }
 0x145   : > { %v1521_v22 = vpack.c.bf16 %v1501_v14, %v1500_v9  ;;  %2107 = vmatprep.mubr.msk.bf16.mxu0 %vm1548_vm11, %v1512_v43  ;;  %v2653_v16 = vpop.permute.xlu1 %2652 }
 0x146   : > { %v1484_v6 = vsel %vm1477_vm10, %v1451_v32, %v2639_v62  ;;  %v1485_v15 = vsel %vm1477_vm10, %v1452_v2, %v2640_v50  ;;  %v2655_v33 = vunpack.i.h.bf16 %v2653_v16  ;;  %v2654_v27 = vunpack.i.l.bf16 %v2653_v16 }
 0x147   : > { %v1513_v54 = vpack.c.bf16 %v1485_v15, %v1484_v6  ;;  %v2648_v23 = vpop.permute.xlu0 %2647  ;;  %2124 = vmatmul.mubr.msk.bf16.gmra.mrb[4].mxu1 %vm1548_vm11, %v1521_v22 }
 0x148   : > { %v2650_v37 = vunpack.i.h.bf16 %v2648_v23  ;;  %v2649_v44 = vunpack.i.l.bf16 %v2648_v23  ;;  %v1370_v47 = vsel %vm1345_vm6, %v3857_v18, %v2654_v27  ;;  %v1371_v21 = vsel %vm1345_vm6, %v4647_v20, %v2655_v33 }
 0x149   : > { %2108 = vmatmul.mubr.msk.bf16.gmra.mrb[4].mxu0 %vm1548_vm11, %v1513_v54  ;;  %v2663_v63 = vpop.permute.xlu1 %2662 }
 0x14a   : > { %v2665_v11 = vunpack.i.h.bf16 %v2663_v63  ;;  %v2664_v45 = vunpack.i.l.bf16 %v2663_v63  ;;  %v1354_v48 = vsel %vm1345_vm6, %v4648_v34, %v2649_v44  ;;  %v1355_v39 = vsel %vm1345_vm6, %v4649_v35, %v2650_v37 }
 0x14b   : > { %v2658_v24 = vpop.permute.xlu0 %2657 }
 0x14c   : > { %v2660_v53 = vunpack.i.h.bf16 %v2658_v24  ;;  %v2659_v38 = vunpack.i.l.bf16 %v2658_v24  ;;  %v1372_v51 = vsel %vm1345_vm6, %v4650_v19, %v2664_v45  ;;  %v1373_v31 = vsel %vm1345_vm6, %v4651_v0, %v2665_v11 }
 0x14d   : > { %v2673_v49 = vpop.permute.xlu1 %2672 }
 0x14e   : > { %v2675_v59 = vunpack.i.h.bf16 %v2673_v49  ;;  %v2674_v56 = vunpack.i.l.bf16 %v2673_v49  ;;  %v1357_v18 = vsel %vm1345_vm6, %v4652_v30, %v2660_v53  ;;  %v1356_v12 = vsel %vm1345_vm6, %v4653_v52, %v2659_v38 }
 0x14f   : > { %v2668_v10 = vpop.permute.xlu0 %2667 }
 0x150   : > { %v2670_v46 = vunpack.i.h.bf16 %v2668_v10  ;;  %v2669_v42 = vunpack.i.l.bf16 %v2668_v10  ;;  %v1403_v17 = vsel %vm1378_vm7, %v1370_v47, %v2674_v56  ;;  %v1404_v5 = vsel %vm1378_vm7, %v1371_v21, %v2675_v59 }
 0x151   : > { %v2683_v60 = vpop.permute.xlu1 %2682 }
 0x152   : > { %v2685_v40 = vunpack.i.h.bf16 %v2683_v60  ;;  %v2684_v1 = vunpack.i.l.bf16 %v2683_v60  ;;  %v1387_v13 = vsel %vm1378_vm7, %v1354_v48, %v2669_v42  ;;  %v1388_v43 = vsel %vm1378_vm7, %v1355_v39, %v2670_v46 }
 0x153   : > { %v2678_v28 = vpop.permute.xlu0 %2677 }
 0x154   : > { %v2680_v25 = vunpack.i.h.bf16 %v2678_v28  ;;  %v2679_v8 = vunpack.i.l.bf16 %v2678_v28  ;;  %v1405_v50 = vsel %vm1378_vm7, %v1372_v51, %v2684_v1  ;;  %v1406_v62 = vsel %vm1378_vm7, %v1373_v31, %v2685_v40 }
 0x155   : > { %v2693_v4 = vpop.permute.xlu1 %2692 }
 0x156   : > { %v2695_v57 = vunpack.i.h.bf16 %v2693_v4  ;;  %v2694_v29 = vunpack.i.l.bf16 %v2693_v4  ;;  %v1389_v22 = vsel %vm1378_vm7, %v1356_v12, %v2679_v8  ;;  %v1390_v16 = vsel %vm1378_vm7, %v1357_v18, %v2680_v25 }
 0x157   : > { %v2688_v36 = vpop.permute.xlu0 %2687 }
 0x158   : > { %v2690_v7 = vunpack.i.h.bf16 %v2688_v36  ;;  %v2689_v26 = vunpack.i.l.bf16 %v2688_v36  ;;  %v1436_v23 = vsel %vm1411_vm8, %v1403_v17, %v2694_v29  ;;  %v1437_v63 = vsel %vm1411_vm8, %v1404_v5, %v2695_v57 }
 0x159   : > { %v2703_v55 = vpop.permute.xlu1 %2702 }
 0x15a   : > { %v2705_v3 = vunpack.i.h.bf16 %v2703_v55  ;;  %v2704_v9 = vunpack.i.l.bf16 %v2703_v55  ;;  %v1420_v24 = vsel %vm1411_vm8, %v1387_v13, %v2689_v26  ;;  %v1421_v49 = vsel %vm1411_vm8, %v1388_v43, %v2690_v7 }
 0x15b   : > { %v4262_v58 = vpop.permute.xlu0 %2697 }
 0x15c   : > { %v2699_v32 = vunpack.i.l.bf16 %v4262_v58  ;;  %v1438_v10 = vsel %vm1411_vm8, %v1405_v50, %v2704_v9  ;;  %v1439_v60 = vsel %vm1411_vm8, %v1406_v62, %v2705_v3  ;;  %v2700_v28 = vunpack.i.h.bf16 %v4262_v58 }
 0x15d   : > { %v2713_v61 = vpop.permute.xlu1 %2712 }
 0x15e   : > { %v2714_v2 = vunpack.i.l.bf16 %v2713_v61  ;;  %v2715_v6 = vunpack.i.h.bf16 %v2713_v61  ;;  %v1422_v33 = vsel %vm1411_vm8, %v1389_v22, %v2699_v32  ;;  %v1423_v31 = vsel %vm1411_vm8, %v1390_v16, %v2700_v28  ;;  %v4655_v28 = vld [vmem:[#allocation27_spill] sm:$0xff] }
 0x15f   : > { %v2708_v41 = vpop.permute.xlu0 %2707 }
 0x160   : > { %v2709_v15 = vunpack.i.l.bf16 %v2708_v41  ;;  %v2710_v4 = vunpack.i.h.bf16 %v2708_v41  ;;  %v1469_v27 = vsel %vm1444_vm9, %v1436_v23, %v2714_v2  ;;  %v1470_v11 = vsel %vm1444_vm9, %v1437_v63, %v2715_v6 }
 0x161   : > { %v2723_v14 = vpop.permute.xlu1 %2722 }
 0x162   : > { %v1453_v45 = vsel %vm1444_vm9, %v1420_v24, %v2709_v15  ;;  %v2725_v55 = vunpack.i.h.bf16 %v2723_v14  ;;  %v2724_v53 = vunpack.i.l.bf16 %v2723_v14  ;;  %v1454_v20 = vsel %vm1444_vm9, %v1421_v49, %v2710_v4 }
 0x163   : > { %v2718_v54 = vpop.permute.xlu0 %2717 }
 0x164   : > { %v2720_v21 = vunpack.i.h.bf16 %v2718_v54  ;;  %v2719_v34 = vunpack.i.l.bf16 %v2718_v54  ;;  %v1471_v46 = vsel %vm1444_vm9, %v1438_v10, %v2724_v53  ;;  %v1472_v42 = vsel %vm1444_vm9, %v1439_v60, %v2725_v55  ;;  %v4654_v10 = vld [vmem:[#allocation26_spill] sm:$0xff] }
 0x165   : > { %v2733_v36 = vpop.permute.xlu1 %2732 }
 0x166   : > { %v2735_v37 = vunpack.i.h.bf16 %v2733_v36  ;;  %v2734_v44 = vunpack.i.l.bf16 %v2733_v36  ;;  %v1455_v1 = vsel %vm1444_vm9, %v1422_v33, %v2719_v34  ;;  %v1456_v17 = vsel %vm1444_vm9, %v1423_v31, %v2720_v21  ;;  %v4656_v36 = vld [vmem:[#allocation11_spill] sm:$0xff] }
 0x167   : > { %v2728_v38 = vpop.permute.xlu0 %2727 }
 0x168   : > { %v1502_v59 = vsel %vm1477_vm10, %v1469_v27, %v2734_v44  ;;  %v1503_v56 = vsel %vm1477_vm10, %v1470_v11, %v2735_v37  ;;  %v2730_v58 = vunpack.i.h.bf16 %v2728_v38  ;;  %v2729_v47 = vunpack.i.l.bf16 %v2728_v38  ;;  %v4657_v27 = vld [vmem:[#allocation22_spill] sm:$0xff]  ;;  %v4658_v44 = vld [vmem:[#allocation24_spill] sm:$0xff] }
 0x169   : > { %v1522_v48 = vpack.c.bf16 %v1503_v56, %v1502_v59  ;;  %v2743_v35 = vpop.permute.xlu1 %2742  ;;  %v4660_v56 = vld [vmem:[#allocation20_spill] sm:$0xff] }
 0x16a   : > { %v1486_v39 = vsel %vm1477_vm10, %v1453_v45, %v2729_v47  ;;  %v1487_v19 = vsel %vm1477_vm10, %v1454_v20, %v2730_v58  ;;  %v2745_v51 = vunpack.i.h.bf16 %v2743_v35  ;;  %v2744_v0 = vunpack.i.l.bf16 %v2743_v35  ;;  %v4659_v45 = vld [vmem:[#allocation25_spill] sm:$0xff]  ;;  %v4661_v47 = vld [vmem:[#allocation8_spill] sm:$0xff] }
 0x16b   : > { %v1514_v61 = vpack.c.bf16 %v1487_v19, %v1486_v39  ;;  %v2738_v30 = vpop.permute.xlu0 %2737  ;;  %2127 = vmatprep.mubr.msk.bf16.mxu1 %vm1548_vm11, %v1522_v48 }
 0x16c   : > { %v1504_v18 = vsel %vm1477_vm10, %v1471_v46, %v2744_v0  ;;  %v1505_v52 = vsel %vm1477_vm10, %v1472_v42, %v2745_v51  ;;  %v2740_v12 = vunpack.i.h.bf16 %v2738_v30  ;;  %v2739_v40 = vunpack.i.l.bf16 %v2738_v30 }
 0x16d   : > { %v1523_v5 = vpack.c.bf16 %v1505_v52, %v1504_v18  ;;  %2111 = vmatprep.mubr.msk.bf16.mxu0 %vm1548_vm11, %v1514_v61  ;;  %v2753_v25 = vpop.permute.xlu1 %2752 }
 0x16e   : > { %v1488_v8 = vsel %vm1477_vm10, %v1455_v1, %v2739_v40  ;;  %v1489_v41 = vsel %vm1477_vm10, %v1456_v17, %v2740_v12  ;;  %v2755_v62 = vunpack.i.h.bf16 %v2753_v25  ;;  %v2754_v32 = vunpack.i.l.bf16 %v2753_v25 }
 0x16f   : > { %v1515_v57 = vpack.c.bf16 %v1489_v41, %v1488_v8  ;;  %v2748_v29 = vpop.permute.xlu0 %2747  ;;  %2128 = vmatmul.mubr.msk.bf16.gmra.mrb[8].mxu1 %vm1548_vm11, %v1523_v5 }
 0x170   : > { %v2750_v2 = vunpack.i.h.bf16 %v2748_v29  ;;  %v2749_v22 = vunpack.i.l.bf16 %v2748_v29  ;;  %v1374_v60 = vsel %vm1345_vm6, %v4654_v10, %v2754_v32  ;;  %v1375_v4 = vsel %vm1345_vm6, %v4655_v28, %v2755_v62 }
 0x171   : > { %2112 = vmatmul.mubr.msk.bf16.gmra.mrb[8].mxu0 %vm1548_vm11, %v1515_v57  ;;  %v2763_v7 = vpop.permute.xlu1 %2762 }
 0x172   : > { %v2765_v16 = vunpack.i.h.bf16 %v2763_v7  ;;  %v2764_v6 = vunpack.i.l.bf16 %v2763_v7  ;;  %v1358_v33 = vsel %vm1345_vm6, %v4656_v36, %v2749_v22  ;;  %v1359_v37 = vsel %vm1345_vm6, %v4657_v27, %v2750_v2 }
 0x173   : > { %v2758_v26 = vpop.permute.xlu0 %2757 }
 0x174   : > { %v2760_v54 = vunpack.i.h.bf16 %v2758_v26  ;;  %v2759_v23 = vunpack.i.l.bf16 %v2758_v26  ;;  %v1376_v11 = vsel %vm1345_vm6, %v4658_v44, %v2764_v6  ;;  %v1377_v55 = vsel %vm1345_vm6, %v4659_v45, %v2765_v16 }
 0x175   : > { %v2773_v13 = vpop.permute.xlu1 %2772 }
 0x176   : > { %v2775_v63 = vunpack.i.h.bf16 %v2773_v13  ;;  %v2774_v24 = vunpack.i.l.bf16 %v2773_v13  ;;  %v1361_v58 = vsel %vm1345_vm6, %v4660_v56, %v2760_v54  ;;  %v1360_v20 = vsel %vm1345_vm6, %v4661_v47, %v2759_v23 }
 0x177   : > { %v2768_v43 = vpop.permute.xlu0 %2767 }
 0x178   : > { %v2770_v53 = vunpack.i.h.bf16 %v2768_v43  ;;  %v2769_v38 = vunpack.i.l.bf16 %v2768_v43  ;;  %v1407_v48 = vsel %vm1378_vm7, %v1374_v60, %v2774_v24  ;;  %v1408_v35 = vsel %vm1378_vm7, %v1375_v4, %v2775_v63 }
 0x179   : > { %v2783_v3 = vpop.permute.xlu1 %2782 }
 0x17a   : > { %v2785_v21 = vunpack.i.h.bf16 %v2783_v3  ;;  %v2784_v34 = vunpack.i.l.bf16 %v2783_v3  ;;  %v1391_v61 = vsel %vm1378_vm7, %v1358_v33, %v2769_v38  ;;  %v1392_v30 = vsel %vm1378_vm7, %v1359_v37, %v2770_v53 }
 0x17b   : > { %v2778_v9 = vpop.permute.xlu0 %2777 }
 0x17c   : > { %v2780_v39 = vunpack.i.h.bf16 %v2778_v9  ;;  %v2779_v19 = vunpack.i.l.bf16 %v2778_v9  ;;  %v1409_v40 = vsel %vm1378_vm7, %v1376_v11, %v2784_v34  ;;  %v1410_v1 = vsel %vm1378_vm7, %v1377_v55, %v2785_v21 }
 0x17d   : > { %v2793_v14 = vpop.permute.xlu1 %2792 }
 0x17e   : > { %v2795_v0 = vunpack.i.h.bf16 %v2793_v14  ;;  %v2794_v31 = vunpack.i.l.bf16 %v2793_v14  ;;  %v1393_v25 = vsel %vm1378_vm7, %v1360_v20, %v2779_v19  ;;  %v1394_v8 = vsel %vm1378_vm7, %v1361_v58, %v2780_v39 }
 0x17f   : > { %v2788_v50 = vpop.permute.xlu0 %2787 }
 0x180   : > { %v2790_v46 = vunpack.i.h.bf16 %v2788_v50  ;;  %v2789_v42 = vunpack.i.l.bf16 %v2788_v50  ;;  %v1440_v7 = vsel %vm1411_vm8, %v1407_v48, %v2794_v31  ;;  %v1441_v26 = vsel %vm1411_vm8, %v1408_v35, %v2795_v0  ;;  %v4377_v0 = vld [vmem:[%s4539_s2] ss:$0 sm:$0xff] }
 0x181   : > { %v2803_v15 = vpop.permute.xlu1 %2802 }
 0x182   : > { %v2805_v18 = vunpack.i.h.bf16 %v2803_v15  ;;  %v2804_v52 = vunpack.i.l.bf16 %v2803_v15  ;;  %v1424_v13 = vsel %vm1411_vm8, %v1391_v61, %v2789_v42  ;;  %v1425_v43 = vsel %vm1411_vm8, %v1392_v30, %v2790_v46 }
 0x183   : > { %v4318_v49 = vpop.permute.xlu0 %2797 }
 0x184   : > { %v2799_v17 = vunpack.i.l.bf16 %v4318_v49  ;;  %v1442_v3 = vsel %vm1411_vm8, %v1409_v40, %v2804_v52  ;;  %v1443_v9 = vsel %vm1411_vm8, %v1410_v1, %v2805_v18  ;;  %v2800_v14 = vunpack.i.h.bf16 %v4318_v49 }
 0x185   : > { %v2813_v59 = vpop.permute.xlu1 %2812 }
 0x186   : > { %v2814_v5 = vunpack.i.l.bf16 %v2813_v59  ;;  %v2815_v41 = vunpack.i.h.bf16 %v2813_v59  ;;  %v1426_v32 = vsel %vm1411_vm8, %v1393_v25, %v2799_v17  ;;  %v1427_v55 = vsel %vm1411_vm8, %v1394_v8, %v2800_v14 }
 0x187   : > { %v2808_v51 = vpop.permute.xlu0 %2807 }
 0x188   : > { %v2809_v57 = vunpack.i.l.bf16 %v2808_v51  ;;  %v2810_v50 = vunpack.i.h.bf16 %v2808_v51  ;;  %v1473_v2 = vsel %vm1444_vm9, %v1440_v7, %v2814_v5  ;;  %v1474_v6 = vsel %vm1444_vm9, %v1441_v26, %v2815_v41 }
 0x189   : > { %v2823_v12 = vpop.permute.xlu1 %2822 }
 0x18a   : > { %v1457_v15 = vsel %vm1444_vm9, %v1424_v13, %v2809_v57  ;;  %v2825_v54 = vunpack.i.h.bf16 %v2823_v12  ;;  %v2824_v23 = vunpack.i.l.bf16 %v2823_v12  ;;  %v1458_v28 = vsel %vm1444_vm9, %v1425_v43, %v2810_v50 }
 0x18b   : > { %v2818_v29 = vpop.permute.xlu0 %2817 }
 0x18c   : > { %v2820_v4 = vunpack.i.h.bf16 %v2818_v29  ;;  %v2819_v36 = vunpack.i.l.bf16 %v2818_v29  ;;  %v1475_v53 = vsel %vm1444_vm9, %v1442_v3, %v2824_v23  ;;  %v1476_v38 = vsel %vm1444_vm9, %v1443_v9, %v2825_v54 }
 0x18d   : > { %v2833_v62 = vpop.permute.xlu1 %2832 }
 0x18e   : > { %v2835_v22 = vunpack.i.h.bf16 %v2833_v62  ;;  %v2834_v16 = vunpack.i.l.bf16 %v2833_v62  ;;  %v1459_v34 = vsel %vm1444_vm9, %v1426_v32, %v2819_v36  ;;  %v1460_v48 = vsel %vm1444_vm9, %v1427_v55, %v2820_v4 }
 0x18f   : > { %v2828_v63 = vpop.permute.xlu0 %2827 }
 0x190   : > { %v1506_v24 = vsel %vm1477_vm10, %v1473_v2, %v2834_v16  ;;  %v1507_v10 = vsel %vm1477_vm10, %v1474_v6, %v2835_v22  ;;  %v2830_v49 = vunpack.i.h.bf16 %v2828_v63  ;;  %v2829_v60 = vunpack.i.l.bf16 %v2828_v63 }
 0x191   : > { %v1524_v33 = vpack.c.bf16 %v1507_v10, %v1506_v24  ;;  %v2843_v27 = vpop.permute.xlu1 %2842 }
 0x192   : > { %v1490_v37 = vsel %vm1477_vm10, %v1457_v15, %v2829_v60  ;;  %v1491_v44 = vsel %vm1477_vm10, %v1458_v28, %v2830_v49  ;;  %v2845_v11 = vunpack.i.h.bf16 %v2843_v27  ;;  %v2844_v45 = vunpack.i.l.bf16 %v2843_v27 }
 0x193   : > { %v1516_v59 = vpack.c.bf16 %v1491_v44, %v1490_v37  ;;  %v2838_v56 = vpop.permute.xlu0 %2837  ;;  %2131 = vmatprep.mubr.msk.bf16.mxu1 %vm1548_vm11, %v1524_v33 }
 0x194   : > { %v1508_v58 = vsel %vm1477_vm10, %v1475_v53, %v2844_v45  ;;  %v1509_v47 = vsel %vm1477_vm10, %v1476_v38, %v2845_v11  ;;  %v2840_v20 = vunpack.i.h.bf16 %v2838_v56  ;;  %v2839_v21 = vunpack.i.l.bf16 %v2838_v56 }
 0x195   : > { %v1525_v35 = vpack.c.bf16 %v1509_v47, %v1508_v58  ;;  %2115 = vmatprep.mubr.msk.bf16.mxu0 %vm1548_vm11, %v1516_v59 }
 0x196   : > { %v1492_v39 = vsel %vm1477_vm10, %v1459_v34, %v2839_v21  ;;  %v1493_v19 = vsel %vm1477_vm10, %v1460_v48, %v2840_v20 }
 0x197   : > { %v1517_v51 = vpack.c.bf16 %v1493_v19, %v1492_v39  ;;  %2132 = vmatmul.mubr.msk.bf16.gmra.mrb[12].mxu1 %vm1548_vm11, %v1525_v35 }
 0x199   : > { %2116 = vmatmul.mubr.msk.bf16.gmra.mrb[12].mxu0 %vm1548_vm11, %v1517_v51 }
 0x1f2   : > { %v2121_v31 = vpop.f32.mrb[0].mxu1 }
 0x1f3   : > { %v1710_v46 = vadd.f32 %v2121_v31, %v4377_v0  ;;  %v1701_v42 = vpop.f32.mrb[1].mxu1 }
 0x1f4   : > { %v2105_v61 = vpop.f32.mrb[0].mxu0  ;;  %v1702_v30 = vadd.f32 %v4377_v0, %v1701_v42  ;;  %v2122_v18 = vpop.f32.mrb[2].mxu1 }
 0x1f5   : > { %v1646_v52 = vadd.f32 %v2105_v61, %v4377_v0  ;;  %v1782_v12 = vadd.f32 3.0, %v1710_v46  ;;  %v1637_v40 = vpop.f32.mrb[1].mxu0  ;;  %v1713_v1 = vadd.f32 %v2122_v18, %v4377_v0  ;;  %v1704_v17 = vpop.f32.mrb[3].mxu1 }
 0x1f6   : > { %v1638_v5 = vadd.f32 %v4377_v0, %v1637_v40  ;;  %v1780_v25 = vadd.f32 3.0, %v1702_v30  ;;  %v2106_v8 = vpop.f32.mrb[2].mxu0  ;;  %v1705_v41 = vadd.f32 %v4377_v0, %v1704_v17 }
 0x1f7   : > { %v1766_v57 = vadd.f32 3.0, %v1646_v52  ;;  %v1814_v29 = vmax.f32 %v1782_v12, 0.0  ;;  %v1649_v7 = vadd.f32 %v2106_v8, %v4377_v0  ;;  %v1783_v26 = vadd.f32 3.0, %v1713_v1  ;;  %v1640_v13 = vpop.f32.mrb[3].mxu0 }
 0x1f8   : > { %v1764_v43 = vadd.f32 3.0, %v1638_v5  ;;  %v1812_v3 = vmax.f32 %v1780_v25, 0.0  ;;  %v1641_v9 = vadd.f32 %v4377_v0, %v1640_v13  ;;  %v1781_v14 = vadd.f32 3.0, %v1705_v41 }
 0x1f9   : > { %v1798_v50 = vmax.f32 %v1766_v57, 0.0  ;;  %v1846_v62 = vmin.f32 %v1814_v29, 6.0  ;;  %v1767_v32 = vadd.f32 3.0, %v1649_v7  ;;  %v1815_v2 = vmax.f32 %v1783_v26, 0.0 }
 0x1fa   : > { %v1796_v22 = vmax.f32 %v1764_v43, 0.0  ;;  %v1844_v16 = vmin.f32 %v1812_v3, 6.0  ;;  %v1765_v6 = vadd.f32 3.0, %v1641_v9  ;;  %v1813_v15 = vmax.f32 %v1781_v14, 0.0 }
 0x1fb   : > { %v1830_v54 = vmin.f32 %v1798_v50, 6.0  ;;  %v1878_v23 = vmul.f32 %v1846_v62, %v1710_v46  ;;  %v1799_v63 = vmax.f32 %v1767_v32, 0.0  ;;  %v1847_v24 = vmin.f32 %v1815_v2, 6.0 }
 0x1fc   : > { %v1828_v10 = vmin.f32 %v1796_v22, 6.0  ;;  %v1876_v49 = vmul.f32 %v1844_v16, %v1702_v30  ;;  %v1797_v60 = vmax.f32 %v1765_v6, 0.0  ;;  %v1845_v28 = vmin.f32 %v1813_v15, 6.0 }
 0x1fd   : > { %v1862_v4 = vmul.f32 %v1830_v54, %v1646_v52  ;;  %v1910_v36 = vmul.f32 0.16666667, %v1878_v23  ;;  %v1831_v33 = vmin.f32 %v1799_v63, 6.0  ;;  %v1879_v27 = vmul.f32 %v1847_v24, %v1713_v1 }
 0x1fe   : > { %v1860_v37 = vmul.f32 %v1828_v10, %v1638_v5  ;;  %v1908_v44 = vmul.f32 0.16666667, %v1876_v49  ;;  %v1829_v11 = vmin.f32 %v1797_v60, 6.0  ;;  %v1877_v45 = vmul.f32 %v1845_v28, %v1705_v41 }
 0x1ff   : > { %v1894_v55 = vmul.f32 0.16666667, %v1862_v4  ;;  %1943 = vst.msk [vmem:[%s4390_s30 + $0x90] sm:$0xff] %vm1924_vm12, %v1910_v36  ;;  %v1863_v53 = vmul.f32 %v1831_v33, %v1649_v7  ;;  %v1911_v38 = vmul.f32 0.16666667, %v1879_v27 }
 0x200   : > { %v1892_v59 = vmul.f32 0.16666667, %v1860_v37  ;;  %1941 = vst.msk [vmem:[%s4390_s30 + $0x80] sm:$0xff] %vm1924_vm12, %v1908_v44  ;;  %v1861_v56 = vmul.f32 %v1829_v11, %v1641_v9  ;;  %v1909_v58 = vmul.f32 0.16666667, %v1877_v45 }
 0x201   : > { %1927 = vst.msk [vmem:[%s4390_s30 + $0x10] sm:$0xff] %vm1924_vm12, %v1894_v55  ;;  %v1895_v47 = vmul.f32 0.16666667, %v1863_v53  ;;  %1944 = vst.msk [vmem:[%s4390_s30 + $0x98] sm:$0xff] %vm1924_vm12, %v1911_v38 }
 0x202   : > { %1925 = vst.msk [vmem:[%s4390_s30] sm:$0xff] %vm1924_vm12, %v1892_v59  ;;  %v1893_v20 = vmul.f32 0.16666667, %v1861_v56  ;;  %1942 = vst.msk [vmem:[%s4390_s30 + $0x88] sm:$0xff] %vm1924_vm12, %v1909_v58 }
 0x203   : > { %1928 = vst.msk [vmem:[%s4390_s30 + $0x18] sm:$0xff] %vm1924_vm12, %v1895_v47 }
 0x204   : > { %1926 = vst.msk [vmem:[%s4390_s30 + $0x8] sm:$0xff] %vm1924_vm12, %v1893_v20 }
 0x21a   : > { %v2125_v21 = vpop.f32.mrb[4].mxu1 }
 0x21b   : > { %v1726_v34 = vadd.f32 %v2125_v21, %v4377_v0  ;;  %v1717_v48 = vpop.f32.mrb[5].mxu1 }
 0x21c   : > { %v2109_v35 = vpop.f32.mrb[4].mxu0  ;;  %v1718_v39 = vadd.f32 %v4377_v0, %v1717_v48  ;;  %v2126_v19 = vpop.f32.mrb[6].mxu1 }
 0x21d   : > { %v1662_v51 = vadd.f32 %v2109_v35, %v4377_v0  ;;  %v1786_v31 = vadd.f32 3.0, %v1726_v34  ;;  %v1653_v46 = vpop.f32.mrb[5].mxu0  ;;  %v1729_v42 = vadd.f32 %v2126_v19, %v4377_v0  ;;  %v1720_v61 = vpop.f32.mrb[7].mxu1 }
 0x21e   : > { %v1654_v30 = vadd.f32 %v4377_v0, %v1653_v46  ;;  %v1784_v18 = vadd.f32 3.0, %v1718_v39  ;;  %v2110_v52 = vpop.f32.mrb[6].mxu0  ;;  %v1721_v12 = vadd.f32 %v4377_v0, %v1720_v61 }
 0x21f   : > { %v1770_v40 = vadd.f32 3.0, %v1662_v51  ;;  %v1818_v1 = vmax.f32 %v1786_v31, 0.0  ;;  %v1665_v17 = vadd.f32 %v2110_v52, %v4377_v0  ;;  %v1787_v5 = vadd.f32 3.0, %v1729_v42  ;;  %v1656_v25 = vpop.f32.mrb[7].mxu0 }
 0x220   : > { %v1768_v8 = vadd.f32 3.0, %v1654_v30  ;;  %v1816_v41 = vmax.f32 %v1784_v18, 0.0  ;;  %v1657_v57 = vadd.f32 %v4377_v0, %v1656_v25  ;;  %v1785_v29 = vadd.f32 3.0, %v1721_v12 }
 0x221   : > { %v1802_v7 = vmax.f32 %v1770_v40, 0.0  ;;  %v1850_v26 = vmin.f32 %v1818_v1, 6.0  ;;  %v1771_v13 = vadd.f32 3.0, %v1665_v17  ;;  %v1819_v43 = vmax.f32 %v1787_v5, 0.0 }
 0x222   : > { %v1800_v3 = vmax.f32 %v1768_v8, 0.0  ;;  %v1848_v9 = vmin.f32 %v1816_v41, 6.0  ;;  %v1769_v14 = vadd.f32 3.0, %v1657_v57  ;;  %v1817_v50 = vmax.f32 %v1785_v29, 0.0 }
 0x223   : > { %v1834_v62 = vmin.f32 %v1802_v7, 6.0  ;;  %v1882_v32 = vmul.f32 %v1850_v26, %v1726_v34  ;;  %v1803_v2 = vmax.f32 %v1771_v13, 0.0  ;;  %v1851_v22 = vmin.f32 %v1819_v43, 6.0 }
 0x224   : > { %v1832_v16 = vmin.f32 %v1800_v3, 6.0  ;;  %v1880_v6 = vmul.f32 %v1848_v9, %v1718_v39  ;;  %v1801_v15 = vmax.f32 %v1769_v14, 0.0  ;;  %v1849_v54 = vmin.f32 %v1817_v50, 6.0 }
 0x225   : > { %v1866_v23 = vmul.f32 %v1834_v62, %v1662_v51  ;;  %v1914_v63 = vmul.f32 0.16666667, %v1882_v32  ;;  %v1835_v24 = vmin.f32 %v1803_v2, 6.0  ;;  %v1883_v10 = vmul.f32 %v1851_v22, %v1729_v42 }
 0x226   : > { %v1864_v49 = vmul.f32 %v1832_v16, %v1654_v30  ;;  %v1912_v60 = vmul.f32 0.16666667, %v1880_v6  ;;  %v1833_v28 = vmin.f32 %v1801_v15, 6.0  ;;  %v1881_v4 = vmul.f32 %v1849_v54, %v1721_v12 }
 0x227   : > { %v1898_v36 = vmul.f32 0.16666667, %v1866_v23  ;;  %1947 = vst.msk [vmem:[%s4390_s30 + $0xb0] sm:$0xff] %vm1924_vm12, %v1914_v63  ;;  %v1867_v33 = vmul.f32 %v1835_v24, %v1665_v17  ;;  %v1915_v27 = vmul.f32 0.16666667, %v1883_v10 }
 0x228   : > { %v1896_v37 = vmul.f32 0.16666667, %v1864_v49  ;;  %1945 = vst.msk [vmem:[%s4390_s30 + $0xa0] sm:$0xff] %vm1924_vm12, %v1912_v60  ;;  %v1865_v44 = vmul.f32 %v1833_v28, %v1657_v57  ;;  %v1913_v11 = vmul.f32 0.16666667, %v1881_v4 }
 0x229   : > { %1931 = vst.msk [vmem:[%s4390_s30 + $0x30] sm:$0xff] %vm1924_vm12, %v1898_v36  ;;  %v1899_v45 = vmul.f32 0.16666667, %v1867_v33  ;;  %1948 = vst.msk [vmem:[%s4390_s30 + $0xb8] sm:$0xff] %vm1924_vm12, %v1915_v27 }
 0x22a   : > { %1929 = vst.msk [vmem:[%s4390_s30 + $0x20] sm:$0xff] %vm1924_vm12, %v1896_v37  ;;  %v1897_v55 = vmul.f32 0.16666667, %v1865_v44  ;;  %1946 = vst.msk [vmem:[%s4390_s30 + $0xa8] sm:$0xff] %vm1924_vm12, %v1913_v11 }
 0x22b   : > { %1932 = vst.msk [vmem:[%s4390_s30 + $0x38] sm:$0xff] %vm1924_vm12, %v1899_v45 }
 0x22c   : > { %1930 = vst.msk [vmem:[%s4390_s30 + $0x28] sm:$0xff] %vm1924_vm12, %v1897_v55 }
 0x242   : > { %v2129_v53 = vpop.f32.mrb[8].mxu1 }
 0x243   : > { %v1742_v38 = vadd.f32 %v2129_v53, %v4377_v0  ;;  %v1733_v59 = vpop.f32.mrb[9].mxu1 }
 0x244   : > { %v2113_v56 = vpop.f32.mrb[8].mxu0  ;;  %v1734_v58 = vadd.f32 %v4377_v0, %v1733_v59  ;;  %v2130_v47 = vpop.f32.mrb[10].mxu1 }
 0x245   : > { %v1678_v20 = vadd.f32 %v2113_v56, %v4377_v0  ;;  %v1790_v21 = vadd.f32 3.0, %v1742_v38  ;;  %v1669_v34 = vpop.f32.mrb[9].mxu0  ;;  %v1745_v48 = vadd.f32 %v2130_v47, %v4377_v0  ;;  %v1736_v35 = vpop.f32.mrb[11].mxu1 }
 0x246   : > { %v1670_v39 = vadd.f32 %v4377_v0, %v1669_v34  ;;  %v1788_v19 = vadd.f32 3.0, %v1734_v58  ;;  %v2114_v51 = vpop.f32.mrb[10].mxu0  ;;  %v1737_v31 = vadd.f32 %v4377_v0, %v1736_v35 }
 0x247   : > { %v1774_v46 = vadd.f32 3.0, %v1678_v20  ;;  %v1822_v42 = vmax.f32 %v1790_v21, 0.0  ;;  %v1681_v61 = vadd.f32 %v2114_v51, %v4377_v0  ;;  %v1791_v30 = vadd.f32 3.0, %v1745_v48  ;;  %v1672_v18 = vpop.f32.mrb[11].mxu0 }
 0x248   : > { %v1772_v52 = vadd.f32 3.0, %v1670_v39  ;;  %v1820_v12 = vmax.f32 %v1788_v19, 0.0  ;;  %v1673_v40 = vadd.f32 %v4377_v0, %v1672_v18  ;;  %v1789_v1 = vadd.f32 3.0, %v1737_v31 }
 0x249   : > { %v1806_v17 = vmax.f32 %v1774_v46, 0.0  ;;  %v1854_v5 = vmin.f32 %v1822_v42, 6.0  ;;  %v1775_v25 = vadd.f32 3.0, %v1681_v61  ;;  %v1823_v8 = vmax.f32 %v1791_v30, 0.0 }
 0x24a   : > { %v1804_v41 = vmax.f32 %v1772_v52, 0.0  ;;  %v1852_v57 = vmin.f32 %v1820_v12, 6.0  ;;  %v1773_v29 = vadd.f32 3.0, %v1673_v40  ;;  %v1821_v7 = vmax.f32 %v1789_v1, 0.0 }
 0x24b   : > { %v1838_v26 = vmin.f32 %v1806_v17, 6.0  ;;  %v1886_v13 = vmul.f32 %v1854_v5, %v1742_v38  ;;  %v1807_v43 = vmax.f32 %v1775_v25, 0.0  ;;  %v1855_v3 = vmin.f32 %v1823_v8, 6.0 }
 0x24c   : > { %v1836_v9 = vmin.f32 %v1804_v41, 6.0  ;;  %v1884_v14 = vmul.f32 %v1852_v57, %v1734_v58  ;;  %v1805_v50 = vmax.f32 %v1773_v29, 0.0  ;;  %v1853_v62 = vmin.f32 %v1821_v7, 6.0 }
 0x24d   : > { %v1870_v32 = vmul.f32 %v1838_v26, %v1678_v20  ;;  %v1918_v2 = vmul.f32 0.16666667, %v1886_v13  ;;  %v1839_v22 = vmin.f32 %v1807_v43, 6.0  ;;  %v1887_v16 = vmul.f32 %v1855_v3, %v1745_v48 }
 0x24e   : > { %v1868_v6 = vmul.f32 %v1836_v9, %v1670_v39  ;;  %v1916_v15 = vmul.f32 0.16666667, %v1884_v14  ;;  %v1837_v54 = vmin.f32 %v1805_v50, 6.0  ;;  %v1885_v23 = vmul.f32 %v1853_v62, %v1737_v31 }
 0x24f   : > { %v1902_v63 = vmul.f32 0.16666667, %v1870_v32  ;;  %1951 = vst.msk [vmem:[%s4390_s30 + $0xd0] sm:$0xff] %vm1924_vm12, %v1918_v2  ;;  %v1871_v24 = vmul.f32 %v1839_v22, %v1681_v61  ;;  %v1919_v10 = vmul.f32 0.16666667, %v1887_v16 }
 0x250   : > { %v1900_v49 = vmul.f32 0.16666667, %v1868_v6  ;;  %1949 = vst.msk [vmem:[%s4390_s30 + $0xc0] sm:$0xff] %vm1924_vm12, %v1916_v15  ;;  %v1869_v60 = vmul.f32 %v1837_v54, %v1673_v40  ;;  %v1917_v28 = vmul.f32 0.16666667, %v1885_v23 }
 0x251   : > { %1935 = vst.msk [vmem:[%s4390_s30 + $0x50] sm:$0xff] %vm1924_vm12, %v1902_v63  ;;  %v1903_v4 = vmul.f32 0.16666667, %v1871_v24  ;;  %1952 = vst.msk [vmem:[%s4390_s30 + $0xd8] sm:$0xff] %vm1924_vm12, %v1919_v10 }
 0x252   : > { %1933 = vst.msk [vmem:[%s4390_s30 + $0x40] sm:$0xff] %vm1924_vm12, %v1900_v49  ;;  %v1901_v36 = vmul.f32 0.16666667, %v1869_v60  ;;  %1950 = vst.msk [vmem:[%s4390_s30 + $0xc8] sm:$0xff] %vm1924_vm12, %v1917_v28 }
 0x253   : > { %1936 = vst.msk [vmem:[%s4390_s30 + $0x58] sm:$0xff] %vm1924_vm12, %v1903_v4 }
 0x254   : > { %1934 = vst.msk [vmem:[%s4390_s30 + $0x48] sm:$0xff] %vm1924_vm12, %v1901_v36 }
 0x26a   : > { %v2133_v33 = vpop.f32.mrb[12].mxu1 }
 0x26b   : > { %v1758_v27 = vadd.f32 %v2133_v33, %v4377_v0  ;;  %v1749_v37 = vpop.f32.mrb[13].mxu1 }
 0x26c   : > { %v2117_v44 = vpop.f32.mrb[12].mxu0  ;;  %v1750_v11 = vadd.f32 %v4377_v0, %v1749_v37  ;;  %v2134_v45 = vpop.f32.mrb[14].mxu1 }
 0x26d   : > { %v1694_v55 = vadd.f32 %v2117_v44, %v4377_v0  ;;  %v1794_v53 = vadd.f32 3.0, %v1758_v27  ;;  %v1685_v38 = vpop.f32.mrb[13].mxu0  ;;  %v1761_v59 = vadd.f32 %v2134_v45, %v4377_v0  ;;  %v1752_v56 = vpop.f32.mrb[15].mxu1 }
 0x26e   : > { %v1686_v58 = vadd.f32 %v4377_v0, %v1685_v38  ;;  %v1792_v47 = vadd.f32 3.0, %v1750_v11  ;;  %v2118_v20 = vpop.f32.mrb[14].mxu0  ;;  %v1753_v21 = vadd.f32 %v4377_v0, %v1752_v56 }
 0x26f   : > { %v1778_v34 = vadd.f32 3.0, %v1694_v55  ;;  %v1826_v48 = vmax.f32 %v1794_v53, 0.0  ;;  %v1697_v35 = vadd.f32 %v2118_v20, %v4377_v0  ;;  %v1795_v39 = vadd.f32 3.0, %v1761_v59  ;;  %v1688_v19 = vpop.f32.mrb[15].mxu0 }
 0x270   : > { %v1776_v51 = vadd.f32 3.0, %v1686_v58  ;;  %v1824_v31 = vmax.f32 %v1792_v47, 0.0  ;;  %v1689_v46 = vadd.f32 %v4377_v0, %v1688_v19  ;;  %v1793_v42 = vadd.f32 3.0, %v1753_v21 }
 0x271   : > { %v1810_v61 = vmax.f32 %v1778_v34, 0.0  ;;  %v1858_v30 = vmin.f32 %v1826_v48, 6.0  ;;  %v1779_v18 = vadd.f32 3.0, %v1697_v35  ;;  %v1827_v52 = vmax.f32 %v1795_v39, 0.0 }
 0x272   : > { %v1808_v12 = vmax.f32 %v1776_v51, 0.0  ;;  %v1856_v40 = vmin.f32 %v1824_v31, 6.0  ;;  %v1777_v1 = vadd.f32 3.0, %v1689_v46  ;;  %v1825_v17 = vmax.f32 %v1793_v42, 0.0 }
 0x273   : > { %v1842_v5 = vmin.f32 %v1810_v61, 6.0  ;;  %v1890_v25 = vmul.f32 %v1858_v30, %v1758_v27  ;;  %v1811_v8 = vmax.f32 %v1779_v18, 0.0  ;;  %v1859_v41 = vmin.f32 %v1827_v52, 6.0 }
 0x274   : > { %v1840_v57 = vmin.f32 %v1808_v12, 6.0  ;;  %v1888_v29 = vmul.f32 %v1856_v40, %v1750_v11  ;;  %v1809_v7 = vmax.f32 %v1777_v1, 0.0  ;;  %v1857_v0 = vmin.f32 %v1825_v17, 6.0 }
 0x275   : > { %v1874_v26 = vmul.f32 %v1842_v5, %v1694_v55  ;;  %v1922_v13 = vmul.f32 0.16666667, %v1890_v25  ;;  %v1843_v43 = vmin.f32 %v1811_v8, 6.0  ;;  %v1891_v3 = vmul.f32 %v1859_v41, %v1761_v59 }
 0x276   : > { %v1872_v9 = vmul.f32 %v1840_v57, %v1686_v58  ;;  %v1920_v14 = vmul.f32 0.16666667, %v1888_v29  ;;  %v1841_v50 = vmin.f32 %v1809_v7, 6.0  ;;  %v1889_v62 = vmul.f32 %v1857_v0, %v1753_v21 }
 0x277   : > { %v1906_v32 = vmul.f32 0.16666667, %v1874_v26  ;;  %1955 = vst.msk [vmem:[%s4390_s30 + $0xf0] sm:$0xff] %vm1924_vm12, %v1922_v13  ;;  %v1875_v2 = vmul.f32 %v1843_v43, %v1697_v35  ;;  %v1923_v22 = vmul.f32 0.16666667, %v1891_v3 }
 0x278   : > { %v1904_v16 = vmul.f32 0.16666667, %v1872_v9  ;;  %1953 = vst.msk [vmem:[%s4390_s30 + $0xe0] sm:$0xff] %vm1924_vm12, %v1920_v14  ;;  %v1873_v6 = vmul.f32 %v1841_v50, %v1689_v46  ;;  %v1921_v15 = vmul.f32 0.16666667, %v1889_v62 }
 0x279   : > { %1939 = vst.msk [vmem:[%s4390_s30 + $0x70] sm:$0xff] %vm1924_vm12, %v1906_v32  ;;  %v1907_v54 = vmul.f32 0.16666667, %v1875_v2  ;;  %1956 = vst.msk [vmem:[%s4390_s30 + $0xf8] sm:$0xff] %vm1924_vm12, %v1923_v22 }
 0x27a   : > { %1937 = vst.msk [vmem:[%s4390_s30 + $0x60] sm:$0xff] %vm1924_vm12, %v1904_v16  ;;  %v1905_v23 = vmul.f32 0.16666667, %v1873_v6  ;;  %1954 = vst.msk [vmem:[%s4390_s30 + $0xe8] sm:$0xff] %vm1924_vm12, %v1921_v15 }
 0x27b   : > { %1940 = vst.msk [vmem:[%s4390_s30 + $0x78] sm:$0xff] %vm1924_vm12, %v1907_v54 }
 0x27c   : > { %1938 = vst.msk [vmem:[%s4390_s30 + $0x68] sm:$0xff] %vm1924_vm12, %v1905_v23 }
 0x27d   : > { %2879 = shalt.err (!%p2876_p5)
}
 0x27e   : > { %s2880_s19 = scalar_lea.hbm %s4477_s7, 4096  ;;  %s2884_s26 = scalar_lea.hbm %s4540_s3, 8192 }
 0x27f   : > { %p2881_p6 = scmp.ne.s32.totalorder %s4477_s7, %s2880_s19  ;;  %p2885_p10 = scmp.lt.u32.totalorder %s4477_s7, %s4540_s3 }
 0x280   : > { %p2886_p11 = scmp.lt.u32.totalorder %s2884_s26, %s2880_s19  ;;  %p2888_p13 = scmp.lt.u32.totalorder %s2880_s19, %s4477_s7 }
 0x281   : > { %p2882_p7 = pnand %p2881_p6, %p3018_p4 }
 0x282   : > { %p2887_p12 = por %p2886_p11, %p2885_p10 }
 0x283   : > { %p2883_p9 = pneg %p2882_p7 }
 0x284   : > { %p2889_p0 = por %p2888_p13, %p2887_p12 }
 0x286   : > { %p2890_p1 = pnand %p2889_p0, %p2883_p9 }
 0x288   : > { %2893 = shalt.err (!%p2890_p1)
}
 0x289   : > { %s2956_s29 = smov 128   ;;  %s2957_s30 = smov 8  }
 0x28a   : > { %2140 = dma.vmem_to_hbm [thread:$0]  (%p3018_p4), %s4479_s5, 4096, %s4477_s7, %s4491_s8, %s2956_s29, %s2956_s29, %s2957_s30  }
 0x28b PF: > { %p2146_p2 = scmp.ge.s32.totalorder %s2944_s17, 2  ;;  %s1989_s4 = sand.u32 1, %s2924_s12  }
 0x28c   : > { %s1990_s15 = scalar_lea.sflag [#allocation3], %s1989_s4 }
 0x28d   : > { %p2143_p3 = pnand %p2146_p2, %p3025_p8 }
 0x28f   : > { %2919 = dma.done.wait (!%p2143_p3), %s1990_s15, 4096  }
 0x290   : > { %2921 = vsyncadd (!%p2143_p3), %s1990_s15, 4294963200  ;;  %s16_s17 = sadd.s32 1, %s2944_s17   ;;  %s4662_s12 = smov %s2928_s13 }
 0x291   : > { %p13_p5 = scmp.ge.s32.totalorder %s16_s17, 4   ;;  %s4663_s13 = smov %s2932_s14 }
 0x292   : > { %s4664_s14 = smov %s3031_s25  ;;  %s4665_s15 = smov %s2940_s16 }
 0x293   : > { %s4666_s16 = smov %s4668_s20  ;;  %15 = sbr.rel (!%p13_p5) target bundleno = 4 (0x4), region = 68 }
 0x29a   :  { %1995 = vsyncpa [#allocation3], 1 }
 0x29b   :  { %1997 = vsyncpa [#allocation3 + $0x1], 1 }

</bundles_post_ra>
